<compile_context>
chip_gen: v7x
topology: tpu7x:2x2x1
jax: 0.10.0
libtpu: 0.0.40
codegen_flags: <defaults>
</compile_context>

<pallas_src>
import math

import jax
import jax.numpy as jnp
from jax.experimental import pallas as pl
from jax.experimental.pallas import tpu as pltpu

# ---- "hyper-parameter" constants that the original script pulled from its
# ---- surrounding scope (tdamp, Period, phi, A init).  Chosen deterministically.
TDAMP = 3.0
PERIOD = 2.5
PHI = 0.25
A_INIT = 1.5  # initial value of the learnable scalar parameter self.A

# Folded constants (computed once in Python, baked into the kernel).
NEG_INV_TDAMP = -1.0 / TDAMP
TWO_PI_OVER_PERIOD = 2.0 * math.pi / PERIOD

_LANES = 128
_SUBLANES = 8
_BLOCK_ROWS = 1024                    # fixed (1024, 128) f32 block = 512 KiB/buffer
_SMALL_THRESHOLD = 1024               # below this, dispatch dominates: skip plumbing


def _net_kernel(a_ref, x_ref, o_ref):
    """Elementwise damped-cosine kernel.

    a_ref : (1,)   SMEM — the scalar parameter A
    x_ref : block  VMEM — input delays
    o_ref : block  VMEM — output d
    """
    x = x_ref[...]
    a = a_ref[0]
    damp = jnp.exp(x * NEG_INV_TDAMP)                 # exp(x.neg().div(tdamp))
    osc = jnp.cos(x * TWO_PI_OVER_PERIOD + PHI)       # cos(x*2pi/Period + phi)
    o_ref[...] = damp * osc * a                       # .mul(self.A)


def net_forward(x: jax.Array, a: jax.Array) -> jax.Array:
    """x: (N, 1) float32, a: (1,) float32 -> (N, 1) float32."""
    n, c = x.shape
    total = n * c

    # ---------- small-N path: one full block, no layout plumbing ------------
    if total <= _SMALL_THRESHOLD:
        return pl.pallas_call(
            _net_kernel,
            out_shape=jax.ShapeDtypeStruct((n, c), x.dtype),
            in_specs=[
                pl.BlockSpec(memory_space=pltpu.SMEM),        # A (scalar param)
                pl.BlockSpec((n, c), lambda: (0, 0)),         # x, full block
            ],
            out_specs=pl.BlockSpec((n, c), lambda: (0, 0)),
        )(a, x)

    # ---------- large-N path: lane-dense layout + fixed-block 1-D grid ------
    rows = -(-total // _LANES)                        # ceil-div: lane-dense rows
    if rows <= _BLOCK_ROWS:
        block_rows = -(-rows // _SUBLANES) * _SUBLANES  # sublane-aligned single block
    else:
        block_rows = _BLOCK_ROWS
    rows = -(-rows // block_rows) * block_rows        # pad to whole blocks
    padded = rows * _LANES
    n_blocks = rows // block_rows

    # Padded lanes compute exp(0)*cos(PHI)*A — finite garbage, sliced off below.
    x_flat = jnp.pad(jnp.reshape(x, (-1,)), (0, padded - total))
    x_dense = jnp.reshape(x_flat, (rows, _LANES))

    out_dense = pl.pallas_call(
        _net_kernel,
        out_shape=jax.ShapeDtypeStruct((rows, _LANES), x.dtype),
        grid=(n_blocks,),
        in_specs=[
            pl.BlockSpec(memory_space=pltpu.SMEM),                    # A
            pl.BlockSpec((block_rows, _LANES), lambda i: (i, 0)),     # x tile
        ],
        out_specs=pl.BlockSpec((block_rows, _LANES), lambda i: (i, 0)),
        input_output_aliases={1: 0},              # x_dense is a throwaway temp
        compiler_params=pltpu.CompilerParams(
            dimension_semantics=("parallel",),    # v7x: shard grid over 2 TCs
            vmem_limit_bytes=32 << 20,            # portable to v7x's 64 MiB VMEM
        ),
    )(a, x_dense)

    # Undo the padding / layout change.
    return jnp.reshape(jnp.reshape(out_dense, (-1,))[:total], (n, c))


def _reference(x, a):
    return jnp.exp(-x / TDAMP) * jnp.cos(x * (2.0 * math.pi) / PERIOD + PHI) * a[0]


if __name__ == "__main__":
    key = jax.random.PRNGKey(0)
    k_small, k_big = jax.random.split(key)

    # Deterministic parameter init (mirrors nn.Parameter(torch.tensor([[A]]))).
    a_param = jnp.array([A_INIT], dtype=jnp.float32)

    fwd = jax.jit(net_forward)

    # --- primary case: the module's actual shape, (130, 1) delays -----------
    n = 130
    x = jax.random.uniform(k_small, (n, 1), dtype=jnp.float32, minval=0.0, maxval=10.0)
    out = jax.block_until_ready(fwd(x, a_param))
    assert out.shape == (n, 1)
    assert jnp.allclose(out, _reference(x, a_param), atol=1e-5, rtol=1e-5)

    # --- scaled sanity check: exercises the lane-dense tiled/pipelined path --
    n_big = 300_000   # -> 3 grid blocks of (1024, 128)
    x_big = jax.random.uniform(k_big, (n_big, 1), dtype=jnp.float32, minval=0.0, maxval=10.0)
    out_big = jax.block_until_ready(fwd(x_big, a_param))
    assert out_big.shape == (n_big, 1)
    assert jnp.allclose(out_big, _reference(x_big, a_param), atol=1e-5, rtol=1e-5)

    print("KERNEL_OK")
</pallas_src>

<mosaic_0001>
module attributes {stable_mosaic.version = 11 : i64} {
  func.func @_net_kernel(%arg0: memref<1xf32, #tpu.memory_space<smem>>, %arg1: memref<130x1xf32, #tpu.memory_space<vmem>>, %arg2: memref<130x1xf32, #tpu.memory_space<vmem>>) attributes {dimension_semantics = [], scalar_prefetch = 0 : i64, scratch_operands = 0 : i64, tpu.core_type = #tpu.core_type<tc>} {
    %c0 = arith.constant 0 : index
    %c0_0 = arith.constant 0 : index
    %0 = vector.load %arg1[%c0, %c0_0] : memref<130x1xf32, #tpu.memory_space<vmem>>, vector<130x1xf32>
    %c0_1 = arith.constant 0 : index
    %1 = memref.load %arg0[%c0_1] : memref<1xf32, #tpu.memory_space<smem>>
    %cst = arith.constant -0.333333343 : f32
    %2 = vector.broadcast %cst : f32 to vector<130x1xf32>
    %3 = arith.mulf %0, %2 : vector<130x1xf32>
    %4 = math.exp %3 : vector<130x1xf32>
    %cst_2 = arith.constant 2.51327419 : f32
    %5 = vector.broadcast %cst_2 : f32 to vector<130x1xf32>
    %6 = arith.mulf %0, %5 : vector<130x1xf32>
    %cst_3 = arith.constant 2.500000e-01 : f32
    %7 = vector.broadcast %cst_3 : f32 to vector<130x1xf32>
    %8 = arith.addf %6, %7 : vector<130x1xf32>
    %9 = math.cos %8 : vector<130x1xf32>
    %10 = arith.mulf %4, %9 : vector<130x1xf32>
    %11 = vector.broadcast %1 : f32 to vector<130x1xf32>
    %12 = arith.mulf %10, %11 : vector<130x1xf32>
    %c0_4 = arith.constant 0 : index
    %c0_5 = arith.constant 0 : index
    %13 = vector.load %arg2[%c0_4, %c0_5] : memref<130x1xf32, #tpu.memory_space<vmem>>, vector<130x1xf32>
    tpu.vector_store %arg2[%c0_4, %c0_5], %12 {strides = array<i32>} : memref<130x1xf32, #tpu.memory_space<vmem>>, vector<130x1xf32>,
    return
  }
}

</mosaic_0001>

<bundles_post_ra>
// kernel: net_forward.1
= control target key start
LH: loop header
LB: loop body
LE: loop exit
PB: predicated region body
PF: predicated region fallthrough
CT: control target
= control target key end

     0   :  { %v4228_v41 = vmov 683565275   ;;  %v4226_v43 = vmov 2475754826   ;;  %v4232_v45 = vmov 2131351028   ;;  %s4220_s1 = inlined_call_operand.vmem [shape: f32[130,1], index: 1, kind: input, shape index: {}]   ;;  %s4221_s0 = inlined_call_operand.<no memory space> [shape: f32[1], index: 0, kind: input, shape index: {}]   ;;  %s4222_s2 = inlined_call_operand.vmem [shape: f32[130,1], index: 2, kind: output, shape index: {}]  }
   0x1   :  { %v12_v0 = vld [vmem:[%s4220_s1] sm:$0xff]  ;;  %v13_v1 = vld [vmem:[%s4220_s1 + $0x8] sm:$0xff]  ;;  %v14_v3 = vld [vmem:[%s4220_s1 + $0x10] sm:$0xff]  ;;  %v4234_v47 = vmov 2102212464  }
   0x2   :  { %v81_v2 = vmul.f32 2.5132742, %v12_v0  ;;  %v82_v4 = vmul.f32 2.5132742, %v13_v1  ;;  %v83_v5 = vmul.f32 2.5132742, %v14_v3 }
   0x3   :  { %v2215_v19 = vmul.f32 -0.33333334, %v12_v0  ;;  %v2217_v20 = vmul.f32 -0.33333334, %v13_v1  ;;  %v2222_v22 = vld [vmem:[%s4220_s1 + $0x18] sm:$0xff]  ;;  %v2227_v23 = vld [vmem:[%s4220_s1 + $0x20] sm:$0xff] }
   0x4   :  { %v2200_v6 = vadd.f32 0.25, %v81_v2  ;;  %v2202_v7 = vadd.f32 0.25, %v82_v4  ;;  %v2204_v8 = vadd.f32 0.25, %v83_v5  ;;  %v2232_v28 = vld [vmem:[%s4220_s1 + $0x28] sm:$0xff]  ;;  %v2234_v29 = vmul.f32 -0.33333334, %v14_v3 }
   0x5   :  { %v2237_v30 = vmul.f32 -0.33333334, %v2222_v22  ;;  %v2240_v31 = vmul.f32 -0.33333334, %v2227_v23  ;;  %v2243_v32 = vmul.f32 -0.33333334, %v2232_v28 }
   0x6   :  { %4253 = vst [vmem:[#allocation3_spill] sm:$0xff] %v2202_v7  ;;  %4254 = vst [vmem:[#allocation4_spill] sm:$0xff] %v2204_v8  ;;  %v4225_v9 = vand.u32 2147483647, %v2200_v6  ;;  %v118_v10 = vand.u32 2139095040, %v2200_v6  ;;  %v221_v14 = vand.u32 2139095040, %v2202_v7 }
   0x7   :  { %v4224_v13 = vand.u32 2147483647, %v2202_v7  ;;  %v324_v16 = vand.u32 2139095040, %v2204_v8  ;;  %v4241_v49 = vmov 920167782  }
   0x8   :  { %v119_v11 = vshrl.u32 %v118_v10, 23  ;;  %v122_v12 = vand.u32 8388607, %v4225_v9  ;;  %v222_v17 = vshrl.u32 %v221_v14, 23  ;;  %v4244_v56 = vmov 1326507024  }
   0x9   :  { %v225_v18 = vand.u32 8388607, %v4224_v13  ;;  %v325_v27 = vshrl.u32 %v324_v16, 23 }
   0xa   :  { %v1924_v15 = vadd.s32 4294967169, %v119_v11  ;;  %v123_v24 = vor.u32 8388608, %v122_v12  ;;  %v1928_v25 = vadd.s32 4294967169, %v222_v17 }
   0xb   :  { %v226_v26 = vor.u32 8388608, %v225_v18  ;;  %v2249_v39 = vadd.s32 4294967169, %v325_v27 }
   0xc   :  { %v125_v21 = vadd.s32 1, %v1924_v15  ;;  %v228_v34 = vadd.s32 1, %v1928_v25  ;;  %v2245_v37 = vshll.u32 %v123_v24, 8 }
   0xd   :  { %v2247_v38 = vshll.u32 %v226_v26, 8 }
   0xe   :  { %vm126_vm0 = vcmp.gt.s32.totalorder %v125_v21, 0  ;;  %vm229_vm1 = vcmp.gt.s32.totalorder %v228_v34, 0 }
   0xf   :  { %v127_v33 = vsel %vm126_vm0, %v125_v21, 0  ;;  %v230_v61 = vsel %vm229_vm1, %v228_v34, 0 }
  0x10   :  { %v128_v35 = vshrl.u32 %v127_v33, 5  ;;  %v129_v36 = vand.u32 31, %v127_v33  ;;  %v2263_v0 = vshrl.u32 %v230_v61, 5  ;;  %v232_v1 = vand.u32 31, %v230_v61 }
  0x12   :  { %v130_v40 = vsub.s32 32, %v129_v36  ;;  %v132_v42 = vshll.u32 %v4228_v41, %v129_v36  ;;  %v135_v44 = vshll.u32 %v4226_v43, %v129_v36  ;;  %v138_v46 = vshll.u32 %v4232_v45, %v129_v36 }
  0x13   :  { %v141_v48 = vshll.u32 %v4234_v47, %v129_v36  ;;  %v144_v50 = vshll.u32 %v4241_v49, %v129_v36  ;;  %vm147_vm2 = vcmp.lt.s32.totalorder %v128_v35, 1  ;;  %vm148_vm3 = vcmp.lt.s32.totalorder %v128_v35, 2 }
  0x14   :  { %v131_v51 = vshrl.u32 %v4228_v41, %v130_v40  ;;  %v133_v52 = vshrl.u32 %v4226_v43, %v130_v40  ;;  %v136_v53 = vshrl.u32 %v4232_v45, %v130_v40  ;;  %v139_v54 = vshrl.u32 %v4234_v47, %v130_v40 }
  0x15   :  { %v142_v55 = vshrl.u32 %v4241_v49, %v130_v40  ;;  %v145_v57 = vshrl.u32 %v4244_v56, %v130_v40  ;;  %vm149_vm4 = vcmp.lt.s32.totalorder %v128_v35, 3  ;;  %vm150_vm5 = vcmp.lt.s32.totalorder %v128_v35, 4 }
  0x16   :  { %v134_v58 = vor.u32 %v133_v52, %v132_v42  ;;  %v137_v59 = vor.u32 %v136_v53, %v135_v44  ;;  %v140_v60 = vor.u32 %v139_v54, %v138_v46  ;;  %v233_v14 = vsub.s32 32, %v232_v1 }
  0x17   :  { %v143_v62 = vor.u32 %v142_v55, %v141_v48  ;;  %v146_v63 = vor.u32 %v145_v57, %v144_v50  ;;  %v235_v18 = vshll.u32 %v4228_v41, %v232_v1  ;;  %v238_v42 = vshll.u32 %v4226_v43, %v232_v1 }
  0x18   :  { %v151_v2 = vsel %vm147_vm2, %v131_v51, %v134_v58  ;;  %v152_v3 = vsel %vm150_vm5, %v140_v60, 2102212464  ;;  %v155_v4 = vsel %vm147_vm2, %v134_v58, %v137_v59  ;;  %v159_v5 = vsel %vm147_vm2, %v137_v59, %v140_v60 }
  0x19   :  { %v153_v10 = vsel %vm149_vm4, %v137_v59, %v152_v3  ;;  %v156_v11 = vsel %vm150_vm5, %v143_v62, 920167782  ;;  %v160_v12 = vsel %vm150_vm5, %v146_v63, 1326507024  ;;  %v234_v26 = vshrl.u32 %v4228_v41, %v233_v14 }
  0x1a   :  { %v154_v15 = vsel %vm148_vm3, %v151_v2, %v153_v10  ;;  %v157_v16 = vsel %vm149_vm4, %v140_v60, %v156_v11  ;;  %v161_v17 = vsel %vm149_vm4, %v143_v62, %v160_v12  ;;  %v236_v40 = vshrl.u32 %v4226_v43, %v233_v14 }
  0x1b   :  { %v158_v21 = vsel %vm148_vm3, %v155_v4, %v157_v16  ;;  %v162_v24 = vsel %vm148_vm3, %v159_v5, %v161_v17  ;;  %v170_v25 = vmul.u32 %v2245_v37, %v154_v15  ;;  %v239_v35 = vshrl.u32 %v4232_v45, %v233_v14  ;;  %v2325_v15 = vld [vmem:[%s4220_s1 + $0x30] sm:$0xff]  ;;  %v2330_v16 = vld [vmem:[%s4220_s1 + $0x38] sm:$0xff] }
  0x1c   :  { %v2278_v27 = vmul.u32.u64.low %v2245_v37, %v162_v24  ;;  %v2279_v33 = vmul.u32.u64.high %v2245_v37, %v162_v24, %v2278_v27  ;;  %v2282_v34 = vmul.u32.u64.low %v2245_v37, %v158_v21  ;;  %v2283_v36 = vmul.u32.u64.high %v2245_v37, %v158_v21, %v2282_v34 }
  0x1d   :  { %v241_v44 = vshll.u32 %v4232_v45, %v232_v1  ;;  %v242_v46 = vshrl.u32 %v4234_v47, %v233_v14  ;;  %v244_v48 = vshll.u32 %v4234_v47, %v232_v1  ;;  %v245_v50 = vshrl.u32 %v4241_v49, %v233_v14 }
  0x1e   :  { %v247_v51 = vshll.u32 %v4241_v49, %v232_v1  ;;  %v237_v52 = vor.u32 %v236_v40, %v235_v18  ;;  %v240_v37 = vor.u32 %v239_v35, %v238_v42  ;;  %v248_v53 = vshrl.u32 %v4244_v56, %v233_v14  ;;  %v2370_v35 = vld [vmem:[%s4220_s1 + $0x60] sm:$0xff] }
  0x1f   :  { %vm250_vm6 = vcmp.lt.s32.totalorder %v2263_v0, 1  ;;  %vm172_vm7 = vc.u32 %v2279_v33, %v2282_v34  ;;  %v173_v54 = vadd.s32 1, %v2283_v36  ;;  %v243_v55 = vor.u32 %v242_v46, %v241_v44 }
  0x20   :  { %v331_v57 = vadd.s32 1, %v2249_v39  ;;  %v246_v58 = vor.u32 %v245_v50, %v244_v48  ;;  %v249_v59 = vor.u32 %v248_v53, %v247_v51  ;;  %vm251_vm8 = vcmp.lt.s32.totalorder %v2263_v0, 2  ;;  %v2385_v53 = vld [vmem:[%s4220_s1 + $0x68] sm:$0xff] }
  0x21   :  { %vm252_vm9 = vcmp.lt.s32.totalorder %v2263_v0, 3  ;;  %v174_v60 = vsel %vm172_vm7, %v173_v54, %v2283_v36  ;;  %vm253_vm10 = vcmp.lt.s32.totalorder %v2263_v0, 4  ;;  %v254_v61 = vsel %vm250_vm6, %v234_v26, %v237_v52  ;;  %v2354_v26 = vld [vmem:[%s4220_s1 + $0x50] sm:$0xff]  ;;  %v2359_v0 = vld [vmem:[%s4220_s1 + $0x58] sm:$0xff] }
  0x22   :  { %v258_v62 = vsel %vm250_vm6, %v237_v52, %v240_v37  ;;  %v2308_v63 = vadd.s32 %v174_v60, %v170_v25  ;;  %v255_v1 = vsel %vm253_vm10, %v243_v55, 2102212464  ;;  %v259_v39 = vsel %vm253_vm10, %v246_v58, 920167782  ;;  %v2349_v25 = vld [vmem:[%s4220_s1 + $0x48] sm:$0xff] }
  0x23   :  { %v262_v2 = vsel %vm250_vm6, %v240_v37, %v243_v55  ;;  %v256_v3 = vsel %vm252_vm9, %v240_v37, %v255_v1  ;;  %v260_v4 = vsel %vm252_vm9, %v243_v55, %v259_v39  ;;  %v263_v5 = vsel %vm253_vm10, %v249_v59, 1326507024 }
  0x24   :  { %vm332_vm11 = vcmp.gt.s32.totalorder %v331_v57, 0  ;;  %v84_v10 = vmul.f32 2.5132742, %v2222_v22  ;;  %v176_v11 = vadd.s32 536870912, %v2308_v63  ;;  %v261_v12 = vsel %vm251_vm8, %v258_v62, %v260_v4  ;;  %v2335_v22 = vld [vmem:[%s4220_s1 + $0x40] sm:$0xff] }
  0x25   :  { %v264_v14 = vsel %vm252_vm9, %v246_v58, %v263_v5  ;;  %v257_v17 = vsel %vm251_vm8, %v254_v61, %v256_v3  ;;  %v2342_v21 = vmul.u32.u64.low %v2247_v38, %v261_v12  ;;  %v2343_v24 = vmul.u32.u64.high %v2247_v38, %v261_v12, %v2342_v21 }
  0x26   :  { %v265_v18 = vsel %vm251_vm8, %v262_v2, %v264_v14  ;;  %v36_v27 = vmul.f32 -0.33333334, %v2325_v15  ;;  %v333_v42 = vsel %vm332_vm11, %v331_v57, 0  ;;  %v37_v44 = vmul.f32 -0.33333334, %v2330_v16 }
  0x27   :  { %v2363_v36 = vmul.u32.u64.low %v2247_v38, %v265_v18  ;;  %v2364_v40 = vmul.u32.u64.high %v2247_v38, %v265_v18, %v2363_v36  ;;  %v38_v46 = vmul.f32 -0.33333334, %v2335_v22  ;;  %v335_v48 = vand.u32 31, %v333_v42 }
  0x28   :  { %v2375_v50 = vmul.f32 -0.33333334, %v2349_v25  ;;  %v2378_v51 = vmul.f32 -0.33333334, %v2354_v26  ;;  %v273_v52 = vmul.u32 %v2247_v38, %v257_v17  ;;  %v4223_v37 = vand.u32 2147483647, %v2204_v8 }
  0x29   :  { %v2388_v54 = vmul.f32 -0.33333334, %v2359_v0  ;;  %v2390_v55 = vadd.f32 0.25, %v84_v10  ;;  %v2392_v57 = vshrl.u32 %v176_v11, 30  ;;  %v276_v58 = vadd.s32 1, %v2343_v24  ;;  %v2398_v38 = vld [vmem:[%s4220_s1 + $0x70] sm:$0xff] }
  0x2a   :  { %v2401_v59 = vmul.f32 -0.33333334, %v2370_v35  ;;  %v2404_v60 = vmul.f32 -0.33333334, %v2385_v53  ;;  %vm275_vm12 = vc.u32 %v2364_v40, %v2342_v21  ;;  %v336_v61 = vsub.s32 32, %v335_v48 }
  0x2b   :  { %4255 = vst [vmem:[#allocation5_spill] sm:$0xff] %v2392_v57  ;;  %v2409_v62 = vmul.f32 -0.33333334, %v2398_v38  ;;  %v47_v1 = vmul.f32 1.442695, %v2215_v19  ;;  %v277_v2 = vsel %vm275_vm12, %v276_v58, %v2343_v24  ;;  %v178_v11 = vshll.u32 %v2392_v57, 30 }
  0x2c   :  { %v49_v39 = vmul.f32 1.442695, %v2217_v20  ;;  %v51_v3 = vmul.f32 1.442695, %v2234_v29  ;;  %v53_v4 = vmul.f32 1.442695, %v2237_v30  ;;  %v278_v5 = vadd.s32 %v277_v2, %v273_v52 }
  0x2d   :  { %v328_v10 = vand.u32 8388607, %v4223_v37  ;;  %v334_v12 = vshrl.u32 %v333_v42, 5  ;;  %v347_v14 = vshll.u32 %v4234_v47, %v335_v48  ;;  %v427_v17 = vand.u32 2139095040, %v2390_v55 }
  0x2e   :  { %v338_v19 = vshll.u32 %v4228_v41, %v335_v48  ;;  %v339_v20 = vshrl.u32 %v4226_v43, %v336_v61  ;;  %v341_v18 = vshll.u32 %v4226_v43, %v335_v48  ;;  %v342_v29 = vshrl.u32 %v4232_v45, %v336_v61 }
  0x2f   :  { %v279_v30 = vadd.s32 536870912, %v278_v5  ;;  %v344_v24 = vshll.u32 %v4232_v45, %v335_v48  ;;  %v345_v36 = vshrl.u32 %v4234_v47, %v336_v61  ;;  %v348_v52 = vshrl.u32 %v4241_v49, %v336_v61 }
  0x30   :  { %v55_v42 = vmul.f32 1.442695, %v2240_v31  ;;  %v57_v58 = vmul.f32 1.442695, %v2243_v32  ;;  %v350_v2 = vshll.u32 %v4241_v49, %v335_v48  ;;  %v351_v37 = vshrl.u32 %v4244_v56, %v336_v61 }
  0x31   :  { %v59_v13 = vmul.f32 1.442695, %v36_v27  ;;  %v2432_v9 = vshrl.u32 %v279_v30, 30  ;;  %v329_v43 = vor.u32 8388608, %v328_v10  ;;  %v349_v41 = vor.u32 %v348_v52, %v347_v14 }
  0x32   :  { %v2435_v8 = vsub.s32 %v2308_v63, %v178_v11  ;;  %v340_v45 = vor.u32 %v339_v20, %v338_v19  ;;  %v343_v47 = vor.u32 %v342_v29, %v341_v18  ;;  %vm356_vm13 = vcmp.lt.s32.totalorder %v334_v12, 4 }
  0x33   :  { %v346_v7 = vor.u32 %v345_v36, %v344_v24  ;;  %v352_v57 = vor.u32 %v351_v37, %v350_v2  ;;  %vm353_vm14 = vcmp.lt.s32.totalorder %v334_v12, 1  ;;  %v428_v31 = vshrl.u32 %v427_v17, 23 }
  0x34   :  { %2066 = vpow2.f32 %v47_v1  ;;  %v61_v32 = vmul.f32 1.442695, %v37_v44  ;;  %vm355_vm15 = vcmp.lt.s32.totalorder %v334_v12, 3  ;;  %v362_v48 = vsel %vm356_vm13, %v349_v41, 920167782 }
  0x35   :  { %v2438_v27 = vmul.f32 1.442695, %v38_v46  ;;  %v281_v10 = vshll.u32 %v2432_v9, 30  ;;  %v4256_v14 = vmov 683565275   ;;  %v369_v63 = vshll.u32 %v329_v43, 8 }
  0x36   :  { %v337_v30 = vshrl.u32 %v4256_v14, %v336_v61  ;;  %v181_v11 = vsub.s32 0, %v2435_v8  ;;  %vm354_vm0 = vcmp.lt.s32.totalorder %v334_v12, 2  ;;  %v358_v19 = vsel %vm356_vm13, %v346_v7, 2102212464 }
  0x37   :  { %v361_v37 = vsel %vm353_vm14, %v340_v45, %v343_v47  ;;  %v363_v1 = vsel %vm355_vm15, %v346_v7, %v362_v48  ;;  %v365_v44 = vsel %vm353_vm14, %v343_v47, %v346_v7  ;;  %v366_v17 = vsel %vm356_vm13, %v352_v57, 1326507024 }
  0x38   :  { %v1936_v46 = vadd.s32 4294967169, %v428_v31  ;;  %2068 = vpow2.f32 %v49_v39  ;;  %v2449_v20 = vmul.f32 1.442695, %v2375_v50  ;;  %v2452_v43 = vmul.f32 1.442695, %v2378_v51 }
  0x39   :  { %v367_v61 = vsel %vm355_vm15, %v349_v41, %v366_v17  ;;  %v2455_v18 = vsub.s32 %v278_v5, %v281_v10  ;;  %v357_v29 = vsel %vm353_vm14, %v337_v30, %v340_v45  ;;  %v359_v24 = vsel %vm355_vm15, %v343_v47, %v358_v19 }
  0x3a   :  { %v364_v7 = vsel %vm354_vm0, %v361_v37, %v363_v1  ;;  %2070 = vpow2.f32 %v51_v3  ;;  %v2461_v57 = vmul.f32 1.442695, %v2388_v54  ;;  %v1925_v50 = vmin.u32 %v181_v11, %v2435_v8 }
  0x3b   :  { %v368_v39 = vsel %vm354_vm0, %v365_v44, %v367_v61  ;;  %v2466_v51 = vmul.f32 1.442695, %v2401_v59  ;;  %v434_v36 = vadd.s32 1, %v1936_v46  ;;  %2072 = vpow2.f32 %v53_v4 }
  0x3c   :  { %v2468_v41 = vmul.u32.u64.low %v369_v63, %v368_v39  ;;  %v2469_v5 = vmul.u32.u64.high %v369_v63, %v368_v39, %v2468_v41  ;;  %v360_v45 = vsel %vm354_vm0, %v357_v29, %v359_v24  ;;  %2074 = vpow2.f32 %v55_v42 }
  0x3d   :  { %v2472_v47 = vmul.u32.u64.low %v369_v63, %v364_v7  ;;  %v2473_v52 = vmul.u32.u64.high %v369_v63, %v364_v7, %v2472_v47  ;;  %v2477_v54 = vmul.f32 1.442695, %v2404_v60  ;;  %v284_v3 = vsub.s32 0, %v2455_v18 }
  0x3e   :  { %vm435_vm1 = vcmp.gt.s32.totalorder %v434_v36, 0  ;;  %v2480_v59 = vpop.eup %2066  ;;  %2076 = vpow2.f32 %v57_v58  ;;  %v2483_v2 = vmul.f32 1.442695, %v2409_v62  ;;  %v183_v4 = vclz %v1925_v50 }
  0x3f   :  { %4257 = vst [vmem:[#allocation6_spill] sm:$0xff] %v2480_v59  ;;  %v436_v12 = vsel %vm435_vm1, %v434_v36, 0  ;;  %v85_v31 = vmul.f32 2.5132742, %v2227_v23  ;;  %v2487_v48 = vmul.f32 2.5132742, %v2232_v28  ;;  %v376_v42 = vmul.u32 %v369_v63, %v360_v45 }
  0x40   :  { %vm378_vm2 = vc.u32 %v2469_v5, %v2472_v47  ;;  %2078 = vpow2.f32 %v59_v13  ;;  %v2492_v60 = vmul.f32 2.5132742, %v2325_v15  ;;  %v379_v58 = vadd.s32 1, %v2473_v52  ;;  %v27_v13 = vld [vmem:[%s4220_s1 + $0x78] sm:$0xff] }
  0x41   :  { %v438_v10 = vand.u32 31, %v436_v12  ;;  %v2496_v62 = vmul.f32 2.5132742, %v2330_v16  ;;  %v2499_v30 = vmul.f32 2.5132742, %v2335_v22  ;;  %v1929_v23 = vmin.u32 %v284_v3, %v2455_v18 }
  0x42   :  { %v4240_v28 = vand.u32 2147483647, %v2390_v55  ;;  %v2503_v63 = vpop.eup %2068  ;;  %2080 = vpow2.f32 %v61_v32  ;;  %v2509_v15 = vmul.f32 2.5132742, %v2349_v25  ;;  %v1926_v11 = vadd.s32 4294967294, %v183_v4 }
  0x43   :  { %4258 = vst [vmem:[#allocation7_spill] sm:$0xff] %v2503_v63  ;;  %v380_v16 = vsel %vm378_vm2, %v379_v58, %v2473_v52  ;;  %v2513_v22 = vmul.f32 2.5132742, %v2354_v26  ;;  %v2516_v19 = vmul.f32 2.5132742, %v2359_v0  ;;  %v439_v1 = vsub.s32 32, %v438_v10 }
  0x44   :  { %v381_v37 = vadd.s32 %v380_v16, %v376_v42  ;;  %v2518_v44 = vpop.eup %2070  ;;  %2082 = vpow2.f32 %v2438_v27  ;;  %v2522_v32 = vmul.f32 2.5132742, %v2370_v35  ;;  %v2525_v25 = vmul.f32 2.5132742, %v2385_v53  ;;  %v28_v35 = vld [vmem:[%s4220_s1 + $0x80] sm:$0x3] }
  0x45   :  { %4259 = vst [vmem:[#allocation8_spill] sm:$0xff] %v2518_v44  ;;  %v2528_v17 = vmul.f32 2.5132742, %v2398_v38  ;;  %v2530_v26 = vmul.f32 2.5132742, %v27_v13  ;;  %v286_v46 = vclz %v1929_v23  ;;  %v2534_v29 = vpop.eup %2072  ;;  %vm1927_vm3 = vcmp.lt.s32.totalorder %v1926_v11, 0 }
  0x46   :  { %v382_v0 = vadd.s32 536870912, %v381_v37  ;;  %v431_v61 = vand.u32 8388607, %v4240_v28  ;;  %4260 = vst [vmem:[#allocation9_spill] sm:$0xff] %v2534_v29  ;;  %v2539_v27 = vshrl.u32 %v436_v12, 5  ;;  %v441_v53 = vshll.u32 %v4256_v14, %v438_v10  ;;  %v2543_v7 = vpop.eup %2074 }
  0x47   :  { %v4261_v38 = vmov 2475754826   ;;  %4262 = vst [vmem:[#allocation10_spill] sm:$0xff] %v2543_v7  ;;  %v4263_v41 = vmov 2131351028   ;;  %v451_v42 = vshrl.u32 %v4241_v49, %v439_v1  ;;  %v453_v58 = vshll.u32 %v4241_v49, %v438_v10 }
  0x48   :  { %v444_v24 = vshll.u32 %v4261_v38, %v438_v10  ;;  %v2545_v50 = vshrl.u32 %v382_v0, 30  ;;  %v442_v39 = vshrl.u32 %v4261_v38, %v439_v1  ;;  %v445_v36 = vshrl.u32 %v4263_v41, %v439_v1  ;;  %v2550_v52 = vpop.eup %2076 }
  0x49   :  { %v447_v45 = vshll.u32 %v4263_v41, %v438_v10  ;;  %4264 = vst [vmem:[#allocation11_spill] sm:$0xff] %v2550_v52  ;;  %v4265_v3 = vmov 2102212464   ;;  %2084 = vpow2.f32 %v2449_v20  ;;  %v2557_v23 = vmul.f32 2.5132742, %v28_v35 }
  0x4a   :  { %v448_v4 = vshrl.u32 %v4265_v3, %v439_v1  ;;  %v450_v12 = vshll.u32 %v4265_v3, %v438_v10  ;;  %v1930_v13 = vadd.s32 4294967294, %v286_v46  ;;  %v454_v16 = vshrl.u32 %v4244_v56, %v439_v1  ;;  %v2560_v0 = vpop.eup %2078 }
  0x4b   :  { %4266 = vst [vmem:[#allocation12_spill] sm:$0xff] %v2560_v0  ;;  %v2562_v28 = vadd.f32 0.25, %v85_v31  ;;  %v2565_v52 = vsel %vm1927_vm3, 0, %v1926_v11  ;;  %v432_v7 = vor.u32 8388608, %v431_v61  ;;  %2086 = vpow2.f32 %v2452_v43 }
  0x4c   :  { %v452_v29 = vor.u32 %v451_v42, %v450_v12  ;;  %v443_v44 = vor.u32 %v442_v39, %v441_v53  ;;  %v446_v10 = vor.u32 %v445_v36, %v444_v24  ;;  %v455_v49 = vor.u32 %v454_v16, %v453_v58  ;;  %v2568_v20 = vpop.eup %2080 }
  0x4d   :  { %4267 = vst [vmem:[#allocation13_spill] sm:$0xff] %v2568_v20  ;;  %v384_v46 = vshll.u32 %v2545_v50, 30  ;;  %v449_v35 = vor.u32 %v448_v4, %v447_v45  ;;  %vm456_vm4 = vcmp.lt.s32.totalorder %v2539_v27, 1  ;;  %vm459_vm5 = vcmp.lt.s32.totalorder %v2539_v27, 4 }
  0x4e   :  { %2088 = vpow2.f32 %v2461_v57  ;;  %v191_v31 = vsub.s32 4294967266, %v2565_v52  ;;  %vm1931_vm6 = vcmp.lt.s32.totalorder %v1930_v13, 0  ;;  %vm458_vm7 = vcmp.lt.s32.totalorder %v2539_v27, 3  ;;  %v2576_v43 = vpop.eup %2082 }
  0x4f   :  { %4268 = vst [vmem:[#allocation14_spill] sm:$0xff] %v2576_v43  ;;  %v440_v11 = vshrl.u32 %v4256_v14, %v439_v1  ;;  %v465_v61 = vsel %vm459_vm5, %v452_v29, 920167782  ;;  %v472_v53 = vshll.u32 %v432_v7, 8  ;;  %v530_v24 = vand.u32 2139095040, %v2562_v28 }
  0x50   :  { %vm457_vm8 = vcmp.lt.s32.totalorder %v2539_v27, 2  ;;  %v461_v39 = vsel %vm459_vm5, %v449_v35, 2102212464  ;;  %v464_v36 = vsel %vm456_vm4, %v443_v44, %v446_v10  ;;  %v469_v57 = vsel %vm459_vm5, %v455_v49, 1326507024 }
  0x51   :  { %v2583_v45 = vsel %vm1931_vm6, 0, %v1930_v13  ;;  %v2585_v4 = vsub.s32 %v381_v37, %v384_v46  ;;  %v466_v12 = vsel %vm458_vm7, %v449_v35, %v465_v61  ;;  %v468_v1 = vsel %vm456_vm4, %v446_v10, %v449_v35 }
  0x52   :  { %v2592_v7 = vadd.f32 0.25, %v2487_v48  ;;  %v171_v42 = vadd.s32 %v2282_v34, %v2279_v33  ;;  %v187_v58 = vsub.s32 32, %v2565_v52  ;;  %v192_v16 = vadd.s32 127, %v191_v31 }
  0x53   :  { %v460_v49 = vsel %vm456_vm4, %v440_v11, %v443_v44  ;;  %v462_v37 = vsel %vm458_vm7, %v446_v10, %v461_v39  ;;  %v467_v13 = vsel %vm457_vm8, %v464_v36, %v466_v12  ;;  %v470_v46 = vsel %vm458_vm7, %v452_v29, %v469_v57  ;;  %v2605_v48 = vpop.eup %2084 }
  0x54   :  { %4269 = vst [vmem:[#allocation15_spill] sm:$0xff] %v2605_v48  ;;  %v2608_v35 = vadd.f32 0.25, %v2492_v60  ;;  %v294_v33 = vsub.s32 4294967266, %v2583_v45  ;;  %v471_v34 = vsel %vm457_vm8, %v468_v1, %v470_v46  ;;  %v531_v44 = vshrl.u32 %v530_v24, 23 }
  0x55   :  { %v2614_v31 = vadd.f32 0.25, %v2496_v62  ;;  %v387_v10 = vsub.s32 0, %v2585_v4  ;;  %v2617_v11 = vmul.u32.u64.low %v472_v53, %v471_v34  ;;  %v2618_v61 = vmul.u32.u64.high %v472_v53, %v471_v34, %v2617_v11  ;;  %v2620_v29 = vpop.eup %2086 }
  0x56   :  { %4270 = vst [vmem:[#allocation16_spill] sm:$0xff] %v2620_v29  ;;  %2090 = vpow2.f32 %v2466_v51  ;;  %v463_v60 = vsel %vm457_vm8, %v460_v49, %v462_v37  ;;  %v2625_v39 = vmul.u32.u64.low %v472_v53, %v467_v13  ;;  %v2626_v36 = vmul.u32.u64.high %v472_v53, %v467_v13, %v2625_v39 }
  0x57   :  { %v188_v62 = vshll.u32 %v2435_v8, %v2565_v52  ;;  %v189_v24 = vshrl.u32 %v171_v42, %v187_v58  ;;  %v193_v57 = vshll.u32 %v192_v16, 23  ;;  %v1940_v12 = vadd.s32 4294967169, %v531_v44 }
  0x58   :  { %v2631_v1 = vpop.eup %2088  ;;  %v2634_v46 = vadd.f32 0.25, %v2499_v30  ;;  %v274_v51 = vadd.s32 %v2342_v21, %v2364_v40  ;;  %v290_v27 = vsub.s32 32, %v2583_v45  ;;  %v295_v49 = vadd.s32 127, %v294_v33 }
  0x59   :  { %4271 = vst [vmem:[#allocation17_spill] sm:$0xff] %v2631_v1  ;;  %v1933_v37 = vmin.u32 %v387_v10, %v2585_v4  ;;  %v479_v13 = vmul.u32 %v472_v53, %v463_v60  ;;  %vm481_vm9 = vc.u32 %v2618_v61, %v2625_v39  ;;  %v537_v8 = vadd.s32 1, %v1940_v12 }
  0x5a   :  { %2092 = vpow2.f32 %v2477_v54  ;;  %v2644_v52 = vadd.f32 0.25, %v2509_v15  ;;  %v2647_v30 = vadd.f32 0.25, %v2513_v22  ;;  %v482_v21 = vadd.s32 1, %v2626_v36 }
  0x5b   :  { %v190_v40 = vor.u32 %v189_v24, %v188_v62  ;;  %v194_v42 = vor.u32 4788187, %v193_v57  ;;  %v291_v58 = vshll.u32 %v2455_v18, %v2583_v45  ;;  %vm538_vm10 = vcmp.gt.s32.totalorder %v537_v8, 0  ;;  %v4272_v45 = vld [vmem:[#allocation5_spill] sm:$0xff] }
  0x5c   :  { %v292_v53 = vshrl.u32 %v274_v51, %v290_v27  ;;  %v296_v16 = vshll.u32 %v295_v49, 23  ;;  %v483_v33 = vsel %vm481_vm9, %v482_v21, %v2626_v36  ;;  %v539_v34 = vsel %vm538_vm10, %v537_v8, 0 }
  0x5d   :  { %v389_v54 = vclz %v1933_v37  ;;  %v484_v44 = vadd.s32 %v483_v33, %v479_v13  ;;  %v4243_v15 = vand.u32 2147483647, %v2562_v28  ;;  %v541_v10 = vand.u32 31, %v539_v34 }
  0x5e   :  { %2094 = vpow2.f32 %v2483_v2  ;;  %v2656_v22 = vadd.f32 0.25, %v2516_v19  ;;  %v2659_v11 = vadd.f32 0.25, %v2522_v32  ;;  %v2662_v18 = vadd.f32 0.25, %v2525_v25 }
  0x5f   :  { %vm117_vm11 = vcmp.lt.s32.totalorder %v2200_v6, 0  ;;  %v201_v60 = vsub.s32 4, %v4272_v45  ;;  %v485_v36 = vadd.s32 536870912, %v484_v44  ;;  %v542_v62 = vsub.s32 32, %v541_v10 }
  0x60   :  { %v2666_v24 = vpop.eup %2090  ;;  %v195_v57 = vand.u32 2147483647, %v194_v42  ;;  %v197_v12 = vcvt.s32.f32 %v190_v40  ;;  %v293_v2 = vor.u32 %v292_v53, %v291_v58  ;;  %v297_v51 = vor.u32 4788187, %v296_v16 }
  0x61   :  { %4273 = vst [vmem:[#allocation5_spill] sm:$0xff] %v2666_v24  ;;  %v1934_v19 = vadd.s32 4294967294, %v389_v54  ;;  %v2668_v27 = vshrl.u32 %v485_v36, 30  ;;  %v534_v32 = vand.u32 8388607, %v4243_v15  ;;  %v540_v25 = vshrl.u32 %v539_v34, 5 }
  0x62   :  { %v544_v49 = vshll.u32 %v4256_v14, %v541_v10  ;;  %v545_v37 = vshrl.u32 %v4261_v38, %v542_v62  ;;  %v547_v13 = vshll.u32 %v4261_v38, %v541_v10  ;;  %v548_v8 = vshrl.u32 %v4263_v41, %v542_v62 }
  0x63   :  { %v487_v21 = vshll.u32 %v2668_v27, 30  ;;  %v550_v40 = vshll.u32 %v4263_v41, %v541_v10  ;;  %v551_v42 = vshrl.u32 %v4265_v3, %v542_v62  ;;  %v553_v58 = vshll.u32 %v4265_v3, %v541_v10 }
  0x64   :  { %v2680_v53 = vpop.eup %2092  ;;  %v198_v16 = vmul.f32 %v197_v12, %v195_v57  ;;  %v298_v33 = vand.u32 2147483647, %v297_v51  ;;  %v300_v34 = vcvt.s32.f32 %v293_v2  ;;  %v4275_v54 = vmov 920167782  }
  0x65   :  { %4274 = vst [vmem:[#allocation18_spill] sm:$0xff] %v2680_v53  ;;  %v554_v36 = vshrl.u32 %v4275_v54, %v542_v62  ;;  %vm1935_vm12 = vcmp.lt.s32.totalorder %v1934_v19, 0  ;;  %v2683_v15 = vsub.s32 %v484_v44, %v487_v21  ;;  %v556_v56 = vshll.u32 %v4275_v54, %v541_v10  ;;  %v4281_v21 = vld [vmem:[#allocation3_spill] sm:$0xff] }
  0x66   :  { %v4276_v24 = vmov 1326507024   ;;  %v2690_v29 = vsel %vm117_vm11, %v201_v60, %v4272_v45  ;;  %v535_v48 = vor.u32 8388608, %v534_v32  ;;  %v546_v43 = vor.u32 %v545_v37, %v544_v49 }
  0x67   :  { %v557_v1 = vshrl.u32 %v4276_v24, %v542_v62  ;;  %v549_v53 = vor.u32 %v548_v8, %v547_v13  ;;  %v543_v57 = vshrl.u32 %v4256_v14, %v542_v62  ;;  %v552_v12 = vor.u32 %v551_v42, %v550_v40 }
  0x68   :  { %v555_v2 = vor.u32 %v554_v36, %v553_v58  ;;  %vm559_vm13 = vcmp.lt.s32.totalorder %v540_v25, 1  ;;  %v2693_v51 = vpop.eup %2094  ;;  %v4278_v44 = vand.u32 2147483647, %v2200_v6  ;;  %vm220_vm15 = vcmp.lt.s32.totalorder %v4281_v21, 0 }
  0x69   :  { %4277 = vst [vmem:[#allocation19_spill] sm:$0xff] %v2693_v51  ;;  %v2702_v45 = vsel %vm1935_vm12, 0, %v1934_v19  ;;  %v558_v60 = vor.u32 %v557_v1, %v556_v56  ;;  %vm562_vm0 = vcmp.lt.s32.totalorder %v540_v25, 4  ;;  %v633_v32 = vand.u32 2139095040, %v2592_v7 }
  0x6a   :  { %vm2697_vm14 = vcmp.le.f32.partialorder %v4278_v44, 0.7853982  ;;  %v199_v62 = vxor.u32 2147483648, %v198_v16  ;;  %v301_v49 = vmul.f32 %v300_v34, %v298_v33  ;;  %v490_v37 = vsub.s32 0, %v2683_v15 }
  0x6b   :  { %vm561_vm1 = vcmp.lt.s32.totalorder %v540_v25, 3  ;;  %vm560_vm2 = vcmp.lt.s32.totalorder %v540_v25, 2  ;;  %v564_v13 = vsel %vm562_vm0, %v552_v12, 2102212464  ;;  %v567_v8 = vsel %vm559_vm13, %v546_v43, %v549_v53 }
  0x6c   :  { %v575_v40 = vshll.u32 %v535_v48, 8  ;;  %v397_v42 = vsub.s32 4294967266, %v2702_v45  ;;  %v563_v19 = vsel %vm559_vm13, %v543_v57, %v546_v43  ;;  %v568_v56 = vsel %vm562_vm0, %v555_v2, 920167782 }
  0x6d   :  { %v571_v1 = vsel %vm559_vm13, %v549_v53, %v552_v12  ;;  %v565_v58 = vsel %vm561_vm1, %v549_v53, %v564_v13  ;;  %v569_v33 = vsel %vm561_vm1, %v552_v12, %v568_v56  ;;  %v572_v34 = vsel %vm562_vm0, %v558_v60, 1326507024 }
  0x6e   :  { %v634_v36 = vshrl.u32 %v633_v32, 23  ;;  %v377_v44 = vadd.s32 %v2472_v47, %v2469_v5  ;;  %v1937_v48 = vmin.u32 %v490_v37, %v2683_v15  ;;  %v570_v51 = vsel %vm560_vm2, %v567_v8, %v569_v33 }
  0x6f   :  { %v573_v43 = vsel %vm561_vm1, %v555_v2, %v572_v34  ;;  %v2721_v20 = vmul.u32.u64.low %v575_v40, %v570_v51  ;;  %v2722_v0 = vmul.u32.u64.high %v575_v40, %v570_v51, %v2721_v20  ;;  %v302_v12 = vxor.u32 2147483648, %v301_v49 }
  0x70   :  { %v574_v57 = vsel %vm560_vm2, %v571_v1, %v573_v43  ;;  %v1944_v53 = vadd.s32 4294967169, %v634_v36  ;;  %v566_v60 = vsel %vm560_vm2, %v563_v19, %v565_v58  ;;  %v200_v5 = vsel %vm117_vm11, %v199_v62, %v198_v16 }
  0x71   :  { %v2726_v32 = vmul.u32.u64.low %v575_v40, %v574_v57  ;;  %v2727_v13 = vmul.u32.u64.high %v575_v40, %v574_v57, %v2726_v32  ;;  %v393_v47 = vsub.s32 32, %v2702_v45  ;;  %v398_v37 = vadd.s32 127, %v397_v42 }
  0x72   :  { %v640_v2 = vadd.s32 1, %v1944_v53  ;;  %v2733_v8 = vadd.f32 0.25, %v2528_v17  ;;  %v2736_v51 = vadd.f32 0.25, %v2530_v26  ;;  %v4283_v56 = vand.u32 2147483647, %v4281_v21 }
  0x73   :  { %v492_v19 = vclz %v1937_v48  ;;  %v204_v16 = vsel %vm2697_vm14, 0, %v2690_v29  ;;  %v582_v62 = vmul.u32 %v575_v40, %v566_v60  ;;  %v585_v42 = vadd.s32 1, %v2722_v0 }
  0x74   :  { %4282 = vst [vmem:[#allocation3_spill] sm:$0xff] %v2736_v51  ;;  %vm2740_vm3 = vcmp.le.f32.partialorder %v4283_v56, 0.7853982  ;;  %vm641_vm4 = vcmp.gt.s32.totalorder %v640_v2, 0  ;;  %v203_v17 = vsel %vm2697_vm14, %v2200_v6, %v200_v5  ;;  %v303_v26 = vsel %vm220_vm15, %v302_v12, %v301_v49 }
  0x75   :  { %v304_v1 = vsub.s32 4, %v2432_v9  ;;  %v394_v58 = vshll.u32 %v2585_v4, %v2702_v45  ;;  %v395_v33 = vshrl.u32 %v377_v44, %v393_v47  ;;  %v399_v34 = vshll.u32 %v398_v37, 23 }
  0x76   :  { %vm584_vm5 = vc.u32 %v2727_v13, %v2721_v20  ;;  %v642_v29 = vsel %vm641_vm4, %v640_v2, 0  ;;  %v2759_v40 = vadd.f32 0.25, %v2557_v23  ;;  %v1938_v36 = vadd.s32 4294967294, %v492_v19 }
  0x77   :  { %v586_v10 = vsel %vm584_vm5, %v585_v42, %v2722_v0  ;;  %v4246_v48 = vand.u32 2147483647, %v2592_v7  ;;  %2096 = vcosq.f32 %v203_v17  ;;  %v2763_v49 = vand.u32 3, %v204_v16 }
  0x78   :  { %4286 = vst [vmem:[#allocation20_spill] sm:$0xff] %v2759_v40  ;;  %v587_v43 = vadd.s32 %v586_v10, %v582_v62  ;;  %v644_v57 = vand.u32 31, %v642_v29  ;;  %2098 = vsinq.f32 %v203_v17  ;;  %v2768_v4 = vsel %vm220_vm15, %v304_v1, %v2432_v9 }
  0x79   :  { %v2773_v23 = vsel %vm2740_vm3, %v4281_v21, %v303_v26  ;;  %v396_v45 = vor.u32 %v395_v33, %v394_v58  ;;  %v400_v44 = vor.u32 4788187, %v399_v34  ;;  %vm1939_vm6 = vcmp.lt.s32.totalorder %v1938_v36, 0  ;;  %v4287_v58 = vld [vmem:[#allocation4_spill] sm:$0xff] }
  0x7a   :  { %v588_v53 = vadd.s32 536870912, %v587_v43  ;;  %v645_v12 = vsub.s32 32, %v644_v57  ;;  %v637_v60 = vand.u32 8388607, %v4246_v48  ;;  %v643_v32 = vshrl.u32 %v642_v29, 5 }
  0x7b   :  { %v647_v5 = vshll.u32 %v4256_v14, %v644_v57  ;;  %v650_v37 = vshll.u32 %v4261_v38, %v644_v57  ;;  %v653_v56 = vshll.u32 %v4263_v41, %v644_v57  ;;  %v656_v16 = vshll.u32 %v4265_v3, %v644_v57 }
  0x7c   :  { %v2779_v9 = vshrl.u32 %v588_v53, 30  ;;  %v648_v47 = vshrl.u32 %v4261_v38, %v645_v12  ;;  %v651_v2 = vshrl.u32 %v4263_v41, %v645_v12  ;;  %v654_v19 = vshrl.u32 %v4265_v3, %v645_v12 }
  0x7d   :  { %v657_v62 = vshrl.u32 %v4275_v54, %v645_v12  ;;  %v401_v42 = vand.u32 2147483647, %v400_v44  ;;  %v403_v17 = vcvt.s32.f32 %v396_v45  ;;  %v659_v1 = vshll.u32 %v4275_v54, %v644_v57 }
  0x7e   :  { %v590_v26 = vshll.u32 %v2779_v9, 30  ;;  %2100 = vcosq.f32 %v2773_v23  ;;  %vm323_vm7 = vcmp.lt.s32.totalorder %v4287_v58, 0  ;;  %v2793_v33 = vsel %vm1939_vm6, 0, %v1938_v36 }
  0x7f   :  { %v660_v34 = vshrl.u32 %v4276_v24, %v645_v12  ;;  %v736_v29 = vand.u32 2139095040, %v2608_v35  ;;  %v638_v53 = vor.u32 8388608, %v637_v60  ;;  %v649_v44 = vor.u32 %v648_v47, %v647_v5 }
  0x80   :  { %v2797_v10 = vsub.s32 %v587_v43, %v590_v26  ;;  %v652_v45 = vor.u32 %v651_v2, %v650_v37  ;;  %v646_v48 = vshrl.u32 %v4256_v14, %v645_v12  ;;  %v655_v0 = vor.u32 %v654_v19, %v653_v56 }
  0x81   :  { %v658_v57 = vor.u32 %v657_v62, %v656_v16  ;;  %vm662_vm8 = vcmp.lt.s32.totalorder %v643_v32, 1  ;;  %v2800_v63 = vpop.eup %2096  ;;  %v404_v59 = vmul.f32 %v403_v17, %v401_v42  ;;  %v480_v36 = vadd.s32 %v2625_v39, %v2618_v61 }
  0x82   :  { %v661_v40 = vor.u32 %v660_v34, %v659_v1  ;;  %vm665_vm9 = vcmp.lt.s32.totalorder %v643_v32, 4  ;;  %v2804_v51 = vpop.eup %2098  ;;  %v4288_v43 = vand.u32 2147483647, %v4287_v58  ;;  %v593_v12 = vsub.s32 0, %v2797_v10 }
  0x83   :  { %vm664_vm11 = vcmp.lt.s32.totalorder %v643_v32, 3  ;;  %v667_v5 = vsel %vm665_vm9, %v655_v0, 2102212464  ;;  %v737_v47 = vshrl.u32 %v736_v29, 23  ;;  %v500_v37 = vsub.s32 4294967266, %v2793_v33 }
  0x84   :  { %vm2808_vm10 = vcmp.le.f32.partialorder %v4288_v43, 0.7853982  ;;  %vm663_vm12 = vcmp.lt.s32.totalorder %v643_v32, 2  ;;  %v670_v61 = vsel %vm662_vm8, %v649_v44, %v652_v45  ;;  %v678_v39 = vshll.u32 %v638_v53, 8 }
  0x85   :  { %v666_v2 = vsel %vm662_vm8, %v646_v48, %v649_v44  ;;  %v668_v56 = vsel %vm664_vm11, %v652_v45, %v667_v5  ;;  %v671_v19 = vsel %vm665_vm9, %v658_v57, 920167782  ;;  %v674_v16 = vsel %vm662_vm8, %v652_v45, %v655_v0 }
  0x86   :  { %v405_v62 = vxor.u32 2147483648, %v404_v59  ;;  %v496_v42 = vsub.s32 32, %v2793_v33  ;;  %v672_v17 = vsel %vm664_vm11, %v655_v0, %v671_v19  ;;  %v675_v26 = vsel %vm665_vm9, %v661_v40, 1326507024 }
  0x87   :  { %v1941_v1 = vmin.u32 %v593_v12, %v2797_v10  ;;  %v673_v34 = vsel %vm663_vm12, %v670_v61, %v672_v17  ;;  %v676_v29 = vsel %vm664_vm11, %v658_v57, %v675_v26  ;;  %v1948_v48 = vadd.s32 4294967169, %v737_v47 }
  0x88   :  { %v669_v53 = vsel %vm663_vm12, %v666_v2, %v668_v56  ;;  %v677_v44 = vsel %vm663_vm12, %v674_v16, %v676_v29  ;;  %v2828_v43 = vmul.u32.u64.low %v678_v39, %v673_v34  ;;  %v2829_v45 = vmul.u32.u64.high %v678_v39, %v673_v34, %v2828_v43  ;;  %v2832_v5 = vpop.eup %2100 }
  0x89   :  { %v501_v0 = vadd.s32 127, %v500_v37  ;;  %v2834_v19 = vmul.u32.u64.low %v678_v39, %v677_v44  ;;  %v2835_v40 = vmul.u32.u64.high %v678_v39, %v677_v44, %v2834_v19  ;;  %v743_v12 = vadd.s32 1, %v1948_v48 }
  0x8a   :  { %vm210_vm13 = vcmp.eq.s32.totalorder %v2763_v49, 0  ;;  %v406_v57 = vsel %vm323_vm7, %v405_v62, %v404_v59  ;;  %v4291_v32 = vsub.s32 4, %v2545_v50  ;;  %v497_v61 = vshll.u32 %v2683_v15, %v2793_v33 }
  0x8b   :  { %v498_v2 = vshrl.u32 %v480_v36, %v496_v42  ;;  %v595_v37 = vclz %v1941_v1  ;;  %v685_v56 = vmul.u32 %v678_v39, %v669_v53  ;;  %vm744_vm14 = vcmp.gt.s32.totalorder %v743_v12, 0 }
  0x8c   :  { %v408_v47 = vsel %vm323_vm7, %v4291_v32, %v2545_v50  ;;  %vm213_vm15 = vcmp.eq.s32.totalorder %v2763_v49, 2  ;;  %v214_v16 = vxor.u32 2147483648, %v2800_v63  ;;  %v307_v59 = vsel %vm2740_vm3, 0, %v2768_v4 }
  0x8d   :  { %v688_v62 = vadd.s32 1, %v2829_v45  ;;  %v410_v50 = vsel %vm2808_vm10, 0, %v408_v47  ;;  %v502_v17 = vshll.u32 %v501_v0, 23  ;;  %vm687_vm0 = vc.u32 %v2835_v40, %v2828_v43 }
  0x8e   :  { %v745_v15 = vsel %vm744_vm14, %v743_v12, 0  ;;  %v211_v33 = vxor.u32 2147483648, %v2804_v51  ;;  %v409_v36 = vsel %vm2808_vm10, %v4287_v58, %v406_v57  ;;  %v4249_v25 = vand.u32 2147483647, %v2608_v35 }
  0x8f   :  { %v689_v39 = vsel %vm687_vm0, %v688_v62, %v2829_v45  ;;  %v2863_v4 = vor.u32 %v498_v2, %v497_v61  ;;  %v1942_v42 = vadd.s32 4294967294, %v595_v37  ;;  %v747_v1 = vand.u32 31, %v745_v15 }
  0x90   :  { %v690_v26 = vadd.s32 %v689_v39, %v685_v56  ;;  %v2868_v34 = vsel %vm213_vm15, %v214_v16, %v2804_v51  ;;  %2102 = vsinq.f32 %v2773_v23  ;;  %v2871_v29 = vand.u32 3, %v307_v59 }
  0x91   :  { %v2873_v60 = vand.u32 3, %v410_v50  ;;  %2104 = vcosq.f32 %v409_v36  ;;  %v2875_v48 = vor.u32 4788187, %v502_v17  ;;  %v748_v44 = vsub.s32 32, %v747_v1 }
  0x92   :  { %v691_v53 = vadd.s32 536870912, %v690_v26  ;;  %v2880_v45 = vsel %vm210_vm13, %v2800_v63, %v211_v33  ;;  %2106 = vsinq.f32 %v409_v36  ;;  %v583_v51 = vadd.s32 %v2721_v20, %v2727_v13 }
  0x93   :  { %vm1943_vm1 = vcmp.lt.s32.totalorder %v1942_v42, 0  ;;  %v740_v12 = vand.u32 8388607, %v4249_v25  ;;  %v750_v57 = vshll.u32 %v4256_v14, %v747_v1  ;;  %v751_v32 = vshrl.u32 %v4261_v38, %v748_v44 }
  0x94   :  { %v2886_v19 = vshrl.u32 %v691_v53, 30  ;;  %v753_v63 = vshll.u32 %v4261_v38, %v747_v1  ;;  %v754_v47 = vshrl.u32 %v4263_v41, %v748_v44  ;;  %v504_v61 = vand.u32 2147483647, %v2875_v48 }
  0x95   :  { %v746_v13 = vshrl.u32 %v745_v15, 5  ;;  %v759_v2 = vshll.u32 %v4265_v3, %v747_v1  ;;  %v2897_v37 = vsel %vm1943_vm1, 0, %v1942_v42  ;;  %v756_v56 = vshll.u32 %v4263_v41, %v747_v1 }
  0x96   :  { %v693_v20 = vshll.u32 %v2886_v19, 30  ;;  %v757_v16 = vshrl.u32 %v4265_v3, %v748_v44  ;;  %v760_v59 = vshrl.u32 %v4275_v54, %v748_v44  ;;  %v741_v50 = vor.u32 8388608, %v740_v12 }
  0x97   :  { %v762_v17 = vshll.u32 %v4275_v54, %v747_v1  ;;  %v763_v33 = vshrl.u32 %v4276_v24, %v748_v44  ;;  %vm209_vm2 = vcmp.lt.s32.totalorder %v2763_v49, 2  ;;  %v749_v15 = vshrl.u32 %v4256_v14, %v748_v44 }
  0x98   :  { %v2902_v62 = vsub.s32 %v690_v26, %v693_v20  ;;  %v752_v36 = vor.u32 %v751_v32, %v750_v57  ;;  %v755_v39 = vor.u32 %v754_v47, %v753_v63  ;;  %v839_v42 = vand.u32 2139095040, %v2614_v31 }
  0x99   :  { %vm316_vm3 = vcmp.eq.s32.totalorder %v2871_v29, 2  ;;  %v603_v53 = vsub.s32 4294967266, %v2897_v37  ;;  %v761_v20 = vor.u32 %v760_v59, %v759_v2  ;;  %vm765_vm4 = vcmp.lt.s32.totalorder %v746_v13, 1 }
  0x9a   :  { %v696_v26 = vsub.s32 0, %v2902_v62  ;;  %v2103_v12 = vpop.eup %2102  ;;  %v599_v1 = vsub.s32 32, %v2897_v37  ;;  %v758_v25 = vor.u32 %v757_v16, %v756_v56  ;;  %v764_v0 = vor.u32 %v763_v33, %v762_v17 }
  0x9b   :  { %vm768_vm5 = vcmp.lt.s32.totalorder %v746_v13, 4  ;;  %v2913_v23 = vpop.eup %2104  ;;  %vm313_vm6 = vcmp.eq.s32.totalorder %v2871_v29, 0  ;;  %v600_v44 = vshll.u32 %v2797_v10, %v2897_v37  ;;  %vm767_vm7 = vcmp.lt.s32.totalorder %v746_v13, 3 }
  0x9c   :  { %v1945_v57 = vmin.u32 %v696_v26, %v2902_v62  ;;  %v781_v32 = vshll.u32 %v741_v50, 8  ;;  %v2919_v63 = vpop.eup %2106  ;;  %vm766_vm8 = vcmp.lt.s32.totalorder %v746_v13, 2  ;;  %v769_v47 = vsel %vm765_vm4, %v749_v15, %v752_v36 }
  0x9d   :  { %v770_v2 = vsel %vm768_vm5, %v758_v25, 2102212464  ;;  %v773_v56 = vsel %vm765_vm4, %v752_v36, %v755_v39  ;;  %vm426_vm9 = vcmp.lt.s32.totalorder %v2390_v55, 0  ;;  %v604_v16 = vadd.s32 127, %v603_v53 }
  0x9e   :  { %v698_v59 = vclz %v1945_v57  ;;  %v771_v17 = vsel %vm767_vm7, %v755_v39, %v770_v2  ;;  %v774_v10 = vsel %vm768_vm5, %v761_v20, 920167782  ;;  %v601_v37 = vshrl.u32 %v583_v51, %v599_v1 }
  0x9f   :  { %v775_v50 = vsel %vm767_vm7, %v758_v25, %v774_v10  ;;  %v777_v33 = vsel %vm765_vm4, %v755_v39, %v758_v25  ;;  %v778_v26 = vsel %vm768_vm5, %v764_v0, 1326507024  ;;  %vm207_vm10 = vweird.f32 %v2200_v6 }
  0xa0   :  { %vm312_vm11 = vcmp.lt.s32.totalorder %v2871_v29, 2  ;;  %v1946_v15 = vadd.s32 4294967294, %v698_v59  ;;  %v772_v36 = vsel %vm766_vm8, %v769_v47, %v771_v17  ;;  %v776_v53 = vsel %vm766_vm8, %v773_v56, %v775_v50 }
  0xa1   :  { %v779_v57 = vsel %vm767_vm7, %v761_v20, %v778_v26  ;;  %vm416_vm12 = vcmp.eq.s32.totalorder %v2873_v60, 0  ;;  %v2937_v1 = vmul.u32.u64.low %v781_v32, %v776_v53  ;;  %v2938_v2 = vmul.u32.u64.high %v781_v32, %v776_v53, %v2937_v1 }
  0xa2   :  { %v780_v51 = vsel %vm766_vm8, %v777_v33, %v779_v57  ;;  %v840_v25 = vshrl.u32 %v839_v42, 23  ;;  %v4292_v0 = vand.u32 2147483647, %v2390_v55  ;;  %v605_v47 = vshll.u32 %v604_v16, 23 }
  0xa3   :  { %vm1947_vm14 = vcmp.lt.s32.totalorder %v1946_v15, 0  ;;  %v2947_v56 = vmul.u32.u64.low %v781_v32, %v780_v51  ;;  %v2948_v59 = vmul.u32.u64.high %v781_v32, %v780_v51, %v2947_v56  ;;  %v314_v20 = vxor.u32 2147483648, %v2103_v12 }
  0xa4   :  { %vm2943_vm13 = vcmp.le.f32.partialorder %v4292_v0, 0.7853982  ;;  %v510_v13 = vsub.s32 4, %v2668_v27  ;;  %v701_v17 = vsel %vm1947_vm14, 0, %v1946_v15  ;;  %v1952_v10 = vadd.s32 4294967169, %v840_v25 }
  0xa5   :  { %v216_v42 = vsel %vm209_vm2, %v2880_v45, %v2868_v34  ;;  %vm419_vm15 = vcmp.eq.s32.totalorder %v2873_v60, 2  ;;  %v4295_v16 = vcvt.s32.f32 %v2863_v4  ;;  %v788_v33 = vmul.u32 %v781_v32, %v772_v36 }
  0xa6   :  { %v4296_v26 = vxor.u32 2147483648, %v2832_v5  ;;  %v602_v15 = vor.u32 %v601_v37, %v600_v44  ;;  %v791_v57 = vadd.s32 1, %v2938_v2  ;;  %v846_v51 = vadd.s32 1, %v1952_v10 }
  0xa7   :  { %v507_v50 = vmul.f32 %v4295_v16, %v504_v61  ;;  %v606_v25 = vor.u32 4788187, %v605_v47  ;;  %v706_v49 = vsub.s32 4294967266, %v701_v17  ;;  %vm790_vm0 = vc.u32 %v2948_v59, %v2937_v1 }
  0xa8   :  { %v318_v53 = vsel %vm316_vm3, %v4296_v26, %v2103_v12  ;;  %v4250_v34 = vand.u32 2147483647, %v2614_v31  ;;  %v315_v4 = vsel %vm313_vm6, %v2832_v5, %v314_v20  ;;  %v2974_v48 = vsel %vm426_vm9, %v510_v13, %v2668_v27 }
  0xa9   :  { %v792_v45 = vsel %vm790_vm0, %v791_v57, %v2938_v2  ;;  %vm847_vm1 = vcmp.gt.s32.totalorder %v846_v51, 0  ;;  %v417_v61 = vxor.u32 2147483648, %v2919_v63  ;;  %v420_v12 = vxor.u32 2147483648, %v2913_v23 }
  0xaa   :  { %v508_v44 = vxor.u32 2147483648, %v507_v50  ;;  %v793_v32 = vadd.s32 %v792_v45, %v788_v33  ;;  %v609_v37 = vcvt.s32.f32 %v602_v15  ;;  %v686_v36 = vadd.s32 %v2828_v43, %v2835_v40 }
  0xab   :  { %v702_v0 = vsub.s32 32, %v701_v17  ;;  %v848_v5 = vsel %vm847_vm1, %v846_v51, 0  ;;  %v607_v47 = vand.u32 2147483647, %v606_v25  ;;  %v707_v56 = vadd.s32 127, %v706_v49 }
  0xac   :  { %v794_v20 = vadd.s32 536870912, %v793_v32  ;;  %v843_v27 = vand.u32 8388607, %v4250_v34  ;;  %v2985_v2 = vsel %vm207_vm10, nan, %v216_v42  ;;  %v2989_v13 = vsel %vm312_vm11, %v315_v4, %v318_v53 }
  0xad   :  { %v850_v40 = vand.u32 31, %v848_v5  ;;  %v2997_v10 = vsel %vm416_vm12, %v2913_v23, %v417_v61  ;;  %v3002_v6 = vsel %vm419_vm15, %v420_v12, %v2919_v63  ;;  %v509_v29 = vsel %vm426_vm9, %v508_v44, %v507_v50 }
  0xae   :  { %v3006_v42 = vshrl.u32 %v794_v20, 30  ;;  %v703_v16 = vshll.u32 %v2902_v62, %v701_v17  ;;  %v704_v33 = vshrl.u32 %v686_v36, %v702_v0  ;;  %v942_v53 = vand.u32 2139095040, %v2634_v46 }
  0xaf   :  { %v851_v26 = vsub.s32 32, %v850_v40  ;;  %v3010_v15 = vmul.f32 %v609_v37, %v607_v47  ;;  %v708_v23 = vshll.u32 %v707_v56, 23  ;;  %v844_v51 = vor.u32 8388608, %v843_v27 }
  0xb0   :  { %v796_v57 = vshll.u32 %v3006_v42, 30  ;;  %v853_v63 = vshll.u32 %v4256_v14, %v850_v40  ;;  %v856_v50 = vshll.u32 %v4261_v38, %v850_v40  ;;  %v849_v62 = vshrl.u32 %v848_v5, 5 }
  0xb1   :  { %v854_v25 = vshrl.u32 %v4261_v38, %v851_v26  ;;  %v857_v49 = vshrl.u32 %v4263_v41, %v851_v26  ;;  %v859_v17 = vshll.u32 %v4263_v41, %v850_v40  ;;  %v860_v45 = vshrl.u32 %v4265_v3, %v851_v26 }
  0xb2   :  { %v3017_v4 = vsub.s32 %v793_v32, %v796_v57  ;;  %v705_v61 = vor.u32 %v704_v33, %v703_v16  ;;  %v862_v12 = vshll.u32 %v4265_v3, %v850_v40  ;;  %v939_v44 = vand.u32 2147483647, %v2634_v46 }
  0xb3   :  { %v943_v37 = vshrl.u32 %v942_v53, 23  ;;  %v709_v36 = vor.u32 4788187, %v708_v23  ;;  %v863_v47 = vshrl.u32 %v4275_v54, %v851_v26  ;;  %v3025_v56 = vshll.u32 %v844_v51, 8 }
  0xb4   :  { %v799_v0 = vsub.s32 0, %v3017_v4  ;;  %vm310_vm2 = vweird.f32 %v4281_v21  ;;  %v855_v32 = vor.u32 %v854_v25, %v853_v63  ;;  %v858_v5 = vor.u32 %v857_v49, %v856_v50 }
  0xb5   :  { %v865_v20 = vshll.u32 %v4275_v54, %v850_v40  ;;  %v866_v27 = vshrl.u32 %v4276_v24, %v851_v26  ;;  %vm415_vm3 = vcmp.lt.s32.totalorder %v2873_v60, 2  ;;  %v852_v33 = vshrl.u32 %v4256_v14, %v851_v26 }
  0xb6   :  { %v1949_v16 = vmin.u32 %v799_v0, %v3017_v4  ;;  %v861_v53 = vor.u32 %v860_v45, %v859_v17  ;;  %vm868_vm4 = vcmp.lt.s32.totalorder %v849_v62, 1  ;;  %vm529_vm5 = vcmp.lt.s32.totalorder %v2562_v28, 0 }
  0xb7   :  { %v712_v23 = vcvt.s32.f32 %v705_v61  ;;  %v864_v57 = vor.u32 %v863_v47, %v862_v12  ;;  %v867_v51 = vor.u32 %v866_v27, %v865_v20  ;;  %v1956_v34 = vadd.s32 4294967169, %v943_v37 }
  0xb8   :  { %v801_v63 = vclz %v1949_v16  ;;  %vm869_vm6 = vcmp.lt.s32.totalorder %v849_v62, 2  ;;  %vm870_vm7 = vcmp.lt.s32.totalorder %v849_v62, 3  ;;  %vm871_vm8 = vcmp.lt.s32.totalorder %v849_v62, 4 }
  0xb9   :  { %v710_v40 = vand.u32 2147483647, %v709_v36  ;;  %v873_v25 = vsel %vm871_vm8, %v861_v53, 2102212464  ;;  %v876_v50 = vsel %vm868_vm4, %v855_v32, %v858_v5  ;;  %v877_v49 = vsel %vm871_vm8, %v864_v57, 920167782 }
  0xba   :  { %v1950_v0 = vadd.s32 4294967294, %v801_v63  ;;  %v872_v26 = vsel %vm868_vm4, %v852_v33, %v855_v32  ;;  %v878_v17 = vsel %vm870_vm7, %v861_v53, %v877_v49  ;;  %v880_v45 = vsel %vm868_vm4, %v858_v5, %v861_v53 }
  0xbb   :  { %v874_v43 = vsel %vm870_vm7, %v858_v5, %v873_v25  ;;  %v879_v61 = vsel %vm869_vm6, %v876_v50, %v878_v17  ;;  %v881_v12 = vsel %vm871_vm8, %v867_v51, 1326507024  ;;  %v949_v37 = vadd.s32 1, %v1956_v34 }
  0xbc   :  { %vm1951_vm9 = vcmp.lt.s32.totalorder %v1950_v0, 0  ;;  %v882_v47 = vsel %vm870_vm7, %v864_v57, %v881_v12  ;;  %v3039_v20 = vmul.u32.u64.low %v3025_v56, %v879_v61  ;;  %v3040_v36 = vmul.u32.u64.high %v3025_v56, %v879_v61, %v3039_v20 }
  0xbd   :  { %v512_v27 = vsel %vm2943_vm13, %v2390_v55, %v509_v29  ;;  %v3046_v32 = vsel %vm1951_vm9, 0, %v1950_v0  ;;  %v883_v16 = vsel %vm869_vm6, %v880_v45, %v882_v47  ;;  %vm950_vm10 = vcmp.gt.s32.totalorder %v949_v37, 0 }
  0xbe   :  { %v4297_v5 = vand.u32 2147483647, %v2562_v28  ;;  %v611_v33 = vxor.u32 2147483648, %v3010_v15  ;;  %v875_v53 = vsel %vm869_vm6, %v872_v26, %v874_v43  ;;  %v946_v57 = vand.u32 8388607, %v939_v44 }
  0xbf   :  { %v951_v51 = vsel %vm950_vm10, %v949_v37, 0  ;;  %vm632_vm12 = vcmp.lt.s32.totalorder %v2592_v7, 0  ;;  %v809_v29 = vsub.s32 4294967266, %v3046_v32  ;;  %v3068_v49 = vsel %vm310_vm2, nan, %v2989_v13 }
  0xc0   :  { %vm3051_vm11 = vcmp.le.f32.partialorder %v4297_v5, 0.7853982  ;;  %v3062_v63 = vmul.u32.u64.low %v3025_v56, %v883_v16  ;;  %v3063_v25 = vmul.u32.u64.high %v3025_v56, %v883_v16, %v3062_v63  ;;  %v953_v50 = vand.u32 31, %v951_v51 }
  0xc1   :  { %v4300_v43 = vsel %vm2943_vm13, 0, %v2974_v48  ;;  %v713_v0 = vmul.f32 %v712_v23, %v710_v40  ;;  %v894_v26 = vadd.s32 1, %v3040_v36  ;;  %v3081_v17 = vsel %vm415_vm3, %v2997_v10, %v3002_v6 }
  0xc2   :  { %v3074_v62 = vand.u32 3, %v4300_v43  ;;  %2108 = vcosq.f32 %v512_v27  ;;  %v891_v21 = vmul.u32 %v3025_v56, %v875_v53  ;;  %v954_v13 = vsub.s32 32, %v953_v50 }
  0xc3   :  { %2110 = vsinq.f32 %v512_v27  ;;  %v612_v39 = vsel %vm529_vm5, %v611_v33, %v3010_v15  ;;  %v613_v48 = vsub.s32 4, %v2779_v9  ;;  %v789_v23 = vadd.s32 %v2937_v1, %v2948_v59 }
  0xc4   :  { %v4301_v40 = vand.u32 2147483647, %v2592_v7  ;;  %v805_v10 = vsub.s32 32, %v3046_v32  ;;  %v810_v6 = vadd.s32 127, %v809_v29  ;;  %vm893_vm14 = vc.u32 %v3063_v25, %v3039_v20 }
  0xc5   :  { %v947_v56 = vor.u32 8388608, %v946_v57  ;;  %v714_v45 = vxor.u32 2147483648, %v713_v0  ;;  %v895_v15 = vsel %vm893_vm14, %v894_v26, %v3040_v36  ;;  %v956_v61 = vshll.u32 %v4256_v14, %v953_v50 }
  0xc6   :  { %vm3092_vm13 = vcmp.le.f32.partialorder %v4301_v40, 0.7853982  ;;  %v959_v1 = vshll.u32 %v4261_v38, %v953_v50  ;;  %v896_v59 = vadd.s32 %v895_v15, %v891_v21  ;;  %v3102_v12 = vshrl.u32 %v951_v51, 5 }
  0xc7   :  { %v957_v37 = vshrl.u32 %v4261_v38, %v954_v13  ;;  %v960_v47 = vshrl.u32 %v4263_v41, %v954_v13  ;;  %v806_v27 = vshll.u32 %v3017_v4, %v3046_v32  ;;  %v962_v16 = vshll.u32 %v4263_v41, %v953_v50 }
  0xc8   :  { %v963_v5 = vshrl.u32 %v4265_v3, %v954_v13  ;;  %v965_v36 = vshll.u32 %v4265_v3, %v953_v50  ;;  %v807_v33 = vshrl.u32 %v789_v23, %v805_v10  ;;  %v811_v53 = vshll.u32 %v810_v6, 23 }
  0xc9   :  { %v897_v57 = vadd.s32 536870912, %v896_v59  ;;  %v966_v29 = vshrl.u32 %v4275_v54, %v954_v13  ;;  %v958_v51 = vor.u32 %v957_v37, %v956_v61  ;;  %v961_v63 = vor.u32 %v960_v47, %v959_v1 }
  0xca   :  { %v968_v43 = vshll.u32 %v4275_v54, %v953_v50  ;;  %v969_v26 = vshrl.u32 %v4276_v24, %v954_v13  ;;  %v615_v4 = vsel %vm3051_vm11, %v2562_v28, %v612_v39  ;;  %vm971_vm15 = vcmp.lt.s32.totalorder %v3102_v12, 1 }
  0xcb   :  { %v3117_v32 = vshrl.u32 %v897_v57, 30  ;;  %v967_v21 = vor.u32 %v966_v29, %v965_v36  ;;  %v715_v23 = vsel %vm632_vm12, %v714_v45, %v713_v0  ;;  %v964_v40 = vor.u32 %v963_v5, %v962_v16 }
  0xcc   :  { %vm974_vm0 = vcmp.lt.s32.totalorder %v3102_v12, 4  ;;  %v3123_v10 = vshll.u32 %v947_v56, 8  ;;  %v2109_v50 = vpop.eup %2108  ;;  %vm519_vm1 = vcmp.eq.s32.totalorder %v3074_v62, 0  ;;  %vm522_vm2 = vcmp.eq.s32.totalorder %v3074_v62, 2 }
  0xcd   :  { %v808_v6 = vor.u32 %v807_v33, %v806_v27  ;;  %v812_v39 = vor.u32 4788187, %v811_v53  ;;  %v899_v15 = vshll.u32 %v3117_v32, 30  ;;  %vm973_vm3 = vcmp.lt.s32.totalorder %v3102_v12, 3  ;;  %v2111_v61 = vpop.eup %2110 }
  0xce   :  { %vm413_vm4 = vweird.f32 %v4287_v58  ;;  %v970_v0 = vor.u32 %v969_v26, %v968_v43  ;;  %vm972_vm6 = vcmp.lt.s32.totalorder %v3102_v12, 2  ;;  %v979_v56 = vsel %vm971_vm15, %v958_v51, %v961_v63 }
  0xcf   :  { %v980_v45 = vsel %vm974_vm0, %v967_v21, 920167782  ;;  %v614_v1 = vsel %vm529_vm5, %v613_v48, %v2779_v9  ;;  %2112 = vcosq.f32 %v615_v4  ;;  %v3138_v37 = vsub.s32 %v896_v59, %v899_v15 }
  0xd0   :  { %v955_v47 = vshrl.u32 %v4256_v14, %v954_v13  ;;  %vm518_vm7 = vcmp.lt.s32.totalorder %v3074_v62, 2  ;;  %2114 = vsinq.f32 %v615_v4  ;;  %v3145_v27 = vsel %vm3092_vm13, %v2592_v7, %v715_v23 }
  0xd1   :  { %v976_v16 = vsel %vm974_vm0, %v964_v40, 2102212464  ;;  %v981_v5 = vsel %vm973_vm3, %v964_v40, %v980_v45  ;;  %v813_v9 = vand.u32 2147483647, %v812_v39  ;;  %v815_v48 = vcvt.s32.f32 %v808_v6 }
  0xd2   :  { %v902_v59 = vsub.s32 0, %v3138_v37  ;;  %v982_v13 = vsel %vm972_vm6, %v979_v56, %v981_v5  ;;  %v983_v36 = vsel %vm971_vm15, %v961_v63, %v964_v40  ;;  %v984_v33 = vsel %vm974_vm0, %v970_v0, 1326507024 }
  0xd3   :  { %v3159_v53 = vmul.u32.u64.low %v3123_v10, %v982_v13  ;;  %v3160_v57 = vmul.u32.u64.high %v3123_v10, %v982_v13, %v3159_v53  ;;  %vm516_vm5 = vweird.f32 %v2390_v55  ;;  %v616_v29 = vsel %vm3051_vm11, 0, %v614_v1 }
  0xd4   :  { %v1953_v43 = vmin.u32 %v902_v59, %v3138_v37  ;;  %v975_v26 = vsel %vm971_vm15, %v955_v47, %v958_v51  ;;  %v977_v4 = vsel %vm973_vm3, %v961_v63, %v976_v16  ;;  %v520_v23 = vxor.u32 2147483648, %v2111_v61 }
  0xd5   :  { %v523_v40 = vxor.u32 2147483648, %v2109_v50  ;;  %v716_v6 = vsub.s32 4, %v2886_v19  ;;  %v985_v39 = vsel %vm973_vm3, %v967_v21, %v984_v33  ;;  %2116 = vcosq.f32 %v3145_v27 }
  0xd6   :  { %v904_v15 = vclz %v1953_v43  ;;  %v986_v34 = vsel %vm972_vm6, %v983_v36, %v985_v39  ;;  %v1045_v0 = vand.u32 2139095040, %v2644_v52  ;;  %v816_v56 = vmul.f32 %v815_v48, %v813_v9 }
  0xd7   :  { %v978_v51 = vsel %vm972_vm6, %v975_v26, %v977_v4  ;;  %v3181_v63 = vmul.u32.u64.low %v3123_v10, %v986_v34  ;;  %v3182_v45 = vmul.u32.u64.high %v3123_v10, %v986_v34, %v3181_v63  ;;  %v3184_v1 = vand.u32 3, %v616_v29 }
  0xd8   :  { %vm735_vm8 = vcmp.lt.s32.totalorder %v2608_v35, 0  ;;  %v1954_v21 = vadd.s32 4294967294, %v904_v15  ;;  %v1046_v47 = vshrl.u32 %v1045_v0, 23  ;;  %v521_v16 = vsel %vm519_vm1, %v2109_v50, %v520_v23 }
  0xd9   :  { %v524_v5 = vsel %vm522_vm2, %v523_v40, %v2111_v61  ;;  %v4304_v9 = vand.u32 2147483647, %v2608_v35  ;;  %v997_v48 = vadd.s32 1, %v3160_v57  ;;  %v2113_v59 = vpop.eup %2112  ;;  %v3201_v13 = vsel %vm413_vm4, nan, %v3081_v17 }
  0xda   :  { %vm1955_vm10 = vcmp.lt.s32.totalorder %v1954_v21, 0  ;;  %v994_v50 = vmul.u32 %v3123_v10, %v978_v51  ;;  %v1960_v36 = vadd.s32 4294967169, %v1046_v47  ;;  %v2115_v33 = vpop.eup %2114  ;;  %v717_v61 = vsel %vm632_vm12, %v716_v6, %v2886_v19 }
  0xdb   :  { %vm3193_vm9 = vcmp.le.f32.partialorder %v4304_v9, 0.7853982  ;;  %v817_v29 = vxor.u32 2147483648, %v816_v56  ;;  %v907_v43 = vsel %vm1955_vm10, 0, %v1954_v21  ;;  %vm996_vm11 = vc.u32 %v3182_v45, %v3159_v53 }
  0xdc   :  { %v525_v26 = vsel %vm518_vm7, %v521_v16, %v524_v5  ;;  %vm622_vm14 = vcmp.eq.s32.totalorder %v3184_v1, 0  ;;  %vm625_vm15 = vcmp.eq.s32.totalorder %v3184_v1, 2  ;;  %v912_v58 = vsub.s32 4294967266, %v907_v43 }
  0xdd   :  { %v998_v17 = vsel %vm996_vm11, %v997_v48, %v3160_v57  ;;  %v4251_v10 = vand.u32 2147483647, %v2644_v52  ;;  %v1052_v4 = vadd.s32 1, %v1960_v36  ;;  %v1148_v19 = vand.u32 2139095040, %v2647_v30 }
  0xde   :  { %v623_v23 = vxor.u32 2147483648, %v2115_v33  ;;  %v626_v40 = vxor.u32 2147483648, %v2113_v59  ;;  %v719_v6 = vsel %vm3092_vm13, 0, %v717_v61  ;;  %v999_v39 = vadd.s32 %v998_v17, %v994_v50 }
  0xdf   :  { %v3220_v62 = vsel %vm516_vm5, nan, %v525_v26  ;;  %v818_v15 = vsel %vm735_vm8, %v817_v29, %v816_v56  ;;  %v819_v57 = vsub.s32 4, %v3006_v42  ;;  %vm1053_vm12 = vcmp.gt.s32.totalorder %v1052_v4, 0  ;;  %v3225_v34 = vpop.eup %2116 }
  0xe0   :  { %v892_v0 = vadd.s32 %v3039_v20, %v3063_v25  ;;  %v908_v51 = vsub.s32 32, %v907_v43  ;;  %v913_v63 = vadd.s32 127, %v912_v58  ;;  %v1000_v60 = vadd.s32 536870912, %v999_v39 }
  0xe1   :  { %v3229_v21 = vand.u32 3, %v719_v6  ;;  %v1049_v55 = vand.u32 8388607, %v4251_v10  ;;  %v1054_v47 = vsel %vm1053_vm12, %v1052_v4, 0  ;;  %v1149_v16 = vshrl.u32 %v1148_v19, 23 }
  0xe2   :  { %v3235_v56 = vsel %vm622_vm14, %v2113_v59, %v623_v23  ;;  %v3239_v5 = vsel %vm625_vm15, %v626_v40, %v2115_v33  ;;  %v3244_v20 = vsel %vm3193_vm9, %v2608_v35, %v818_v15  ;;  %v3246_v25 = vshrl.u32 %v1000_v60, 30 }
  0xe3   :  { %2118 = vsinq.f32 %v3145_v27  ;;  %v729_v9 = vxor.u32 2147483648, %v3225_v34  ;;  %v3253_v48 = vsel %vm735_vm8, %v819_v57, %v3006_v42  ;;  %v1056_v59 = vand.u32 31, %v1054_v47 }
  0xe4   :  { %v909_v50 = vshll.u32 %v3138_v37, %v907_v43  ;;  %v910_v36 = vshrl.u32 %v892_v0, %v908_v51  ;;  %v914_v33 = vshll.u32 %v913_v63, 23  ;;  %v1002_v61 = vshll.u32 %v3246_v25, 30 }
  0xe5   :  { %2120 = vcosq.f32 %v3244_v20  ;;  %v1050_v29 = vor.u32 8388608, %v1049_v55  ;;  %v1057_v26 = vsub.s32 32, %v1056_v59  ;;  %v1964_v58 = vadd.s32 4294967169, %v1149_v16 }
  0xe6   :  { %v3258_v27 = vsub.s32 %v999_v39, %v1002_v61  ;;  %v1055_v17 = vshrl.u32 %v1054_v47, 5  ;;  %v1059_v4 = vshll.u32 %v4256_v14, %v1056_v59  ;;  %v1062_v42 = vshll.u32 %v4261_v38, %v1056_v59 }
  0xe7   :  { %v1060_v19 = vshrl.u32 %v4261_v38, %v1057_v26  ;;  %v1063_v37 = vshrl.u32 %v4263_v41, %v1057_v26  ;;  %v1065_v43 = vshll.u32 %v4263_v41, %v1056_v59  ;;  %v1068_v23 = vshll.u32 %v4265_v3, %v1056_v59 }
  0xe8   :  { %v911_v40 = vor.u32 %v910_v36, %v909_v50  ;;  %v915_v6 = vor.u32 4788187, %v914_v33  ;;  %v1005_v15 = vsub.s32 0, %v3258_v27  ;;  %v1066_v39 = vshrl.u32 %v4265_v3, %v1057_v26 }
  0xe9   :  { %v3270_v57 = vadd.s32 %v3159_v53, %v3182_v45  ;;  %v1069_v0 = vshrl.u32 %v4275_v54, %v1057_v26  ;;  %v3273_v51 = vshll.u32 %v1050_v29, 8  ;;  %v1155_v63 = vadd.s32 1, %v1964_v58 }
  0xea   :  { %v1957_v60 = vmin.u32 %v1005_v15, %v3258_v27  ;;  %v1061_v55 = vor.u32 %v1060_v19, %v1059_v4  ;;  %v1064_v47 = vor.u32 %v1063_v37, %v1062_v42  ;;  %v1071_v16 = vshll.u32 %v4275_v54, %v1056_v59 }
  0xeb   :  { %vm621_vm13 = vcmp.lt.s32.totalorder %v3184_v1, 2  ;;  %v1058_v50 = vshrl.u32 %v4256_v14, %v1057_v26  ;;  %v1067_v36 = vor.u32 %v1066_v39, %v1065_v43  ;;  %v1070_v33 = vor.u32 %v1069_v0, %v1068_v23 }
  0xec   :  { %vm1074_vm0 = vcmp.lt.s32.totalorder %v1055_v17, 1  ;;  %v916_v53 = vand.u32 2147483647, %v915_v6  ;;  %v918_v45 = vcvt.s32.f32 %v911_v40  ;;  %v1007_v61 = vclz %v1957_v60 }
  0xed   :  { %v1072_v29 = vshrl.u32 %v4276_v24, %v1057_v26  ;;  %v2119_v10 = vpop.eup %2118  ;;  %vm725_vm1 = vcmp.eq.s32.totalorder %v3229_v21, 0  ;;  %vm1075_vm2 = vcmp.lt.s32.totalorder %v1055_v17, 2  ;;  %vm1076_vm3 = vcmp.lt.s32.totalorder %v1055_v17, 3 }
  0xee   :  { %vm1077_vm4 = vcmp.lt.s32.totalorder %v1055_v17, 4  ;;  %vm1156_vm6 = vcmp.gt.s32.totalorder %v1155_v63, 0  ;;  %v1958_v59 = vadd.s32 4294967294, %v1007_v61  ;;  %v1082_v42 = vsel %vm1074_vm0, %v1061_v55, %v1064_v47 }
  0xef   :  { %v1073_v58 = vor.u32 %v1072_v29, %v1071_v16  ;;  %v1079_v4 = vsel %vm1077_vm4, %v1067_v36, 2102212464  ;;  %v3282_v19 = vpop.eup %2120  ;;  %v1078_v37 = vsel %vm1074_vm0, %v1058_v50, %v1061_v55  ;;  %v1083_v23 = vsel %vm1077_vm4, %v1070_v33, 920167782 }
  0xf0   :  { %v1080_v43 = vsel %vm1076_vm3, %v1064_v47, %v1079_v4  ;;  %v1086_v26 = vsel %vm1074_vm0, %v1064_v47, %v1067_v36  ;;  %vm838_vm7 = vcmp.lt.s32.totalorder %v2614_v31, 0  ;;  %v919_v40 = vmul.f32 %v918_v45, %v916_v53 }
  0xf1   :  { %vm1959_vm5 = vcmp.lt.s32.totalorder %v1958_v59, 0  ;;  %v1084_v6 = vsel %vm1076_vm3, %v1067_v36, %v1083_v23  ;;  %v1087_v15 = vsel %vm1077_vm4, %v1073_v58, 1326507024  ;;  %v1157_v16 = vsel %vm1156_vm6, %v1155_v63, 0 }
  0xf2   :  { %v1010_v39 = vsel %vm1959_vm5, 0, %v1958_v59  ;;  %v1085_v0 = vsel %vm1075_vm2, %v1082_v42, %v1084_v6  ;;  %v1088_v60 = vsel %vm1076_vm3, %v1070_v33, %v1087_v15  ;;  %v1081_v61 = vsel %vm1075_vm2, %v1078_v37, %v1080_v43 }
  0xf3   :  { %v1011_v55 = vsub.s32 32, %v1010_v39  ;;  %v1015_v50 = vsub.s32 4294967266, %v1010_v39  ;;  %v1089_v47 = vsel %vm1075_vm2, %v1086_v26, %v1088_v60  ;;  %v726_v59 = vxor.u32 2147483648, %v2119_v10 }
  0xf4   :  { %v3295_v29 = vmul.u32.u64.low %v3273_v51, %v1089_v47  ;;  %v3296_v53 = vmul.u32.u64.high %v3273_v51, %v1089_v47, %v3295_v29  ;;  %v3299_v36 = vmul.u32.u64.low %v3273_v51, %v1085_v0  ;;  %v3300_v45 = vmul.u32.u64.high %v3273_v51, %v1085_v0, %v3299_v36 }
  0xf5   :  { %2122 = vsinq.f32 %v3244_v20  ;;  %v4307_v63 = vand.u32 2147483647, %v2614_v31  ;;  %v1016_v17 = vadd.s32 127, %v1015_v50  ;;  %v1159_v58 = vand.u32 31, %v1157_v16 }
  0xf6   :  { %vm728_vm10 = vcmp.eq.s32.totalorder %v3229_v21, 2  ;;  %v822_v4 = vsel %vm3193_vm9, 0, %v3253_v48  ;;  %v922_v42 = vsub.s32 4, %v3117_v32  ;;  %v4252_v37 = vand.u32 2147483647, %v2647_v30 }
  0xf7   :  { %vm3306_vm8 = vcmp.le.f32.partialorder %v4307_v63, 0.7853982  ;;  %v3320_v20 = vsel %vm621_vm13, %v3235_v56, %v3239_v5  ;;  %v920_v43 = vxor.u32 2147483648, %v919_v40  ;;  %v1097_v23 = vmul.u32 %v3273_v51, %v1081_v61 }
  0xf8   :  { %v1160_v26 = vsub.s32 32, %v1159_v58  ;;  %v1012_v6 = vshll.u32 %v3258_v27, %v1010_v39  ;;  %v1013_v15 = vshrl.u32 %v3270_v57, %v1011_v55  ;;  %vm1099_vm9 = vc.u32 %v3296_v53, %v3299_v36 }
  0xf9   :  { %v1100_v12 = vadd.s32 1, %v3300_v45  ;;  %v3331_v48 = vsel %vm725_vm1, %v3225_v34, %v726_v59  ;;  %v3335_v1 = vsel %vm728_vm10, %v729_v9, %v2119_v10  ;;  %v3337_v56 = vand.u32 3, %v822_v4 }
  0xfa   :  { %v1017_v5 = vshll.u32 %v1016_v17, 23  ;;  %v3342_v27 = vsel %vm838_vm7, %v922_v42, %v3117_v32  ;;  %v1152_v51 = vand.u32 8388607, %v4252_v37  ;;  %v1162_v39 = vshll.u32 %v4256_v14, %v1159_v58 }
  0xfb   :  { %v1101_v57 = vsel %vm1099_vm9, %v1100_v12, %v3300_v45  ;;  %v1163_v34 = vshrl.u32 %v4261_v38, %v1160_v26  ;;  %v1165_v10 = vshll.u32 %v4261_v38, %v1159_v58  ;;  %v1166_v9 = vshrl.u32 %v4263_v41, %v1160_v26 }
  0xfc   :  { %v1102_v0 = vadd.s32 %v1101_v57, %v1097_v23  ;;  %v832_v60 = vxor.u32 2147483648, %v3282_v19  ;;  %v921_v32 = vsel %vm838_vm7, %v920_v43, %v919_v40  ;;  %v1014_v55 = vor.u32 %v1013_v15, %v1012_v6 }
  0xfd   :  { %v1158_v50 = vshrl.u32 %v1157_v16, 5  ;;  %v1018_v61 = vor.u32 4788187, %v1017_v5  ;;  %v1168_v29 = vshll.u32 %v4263_v41, %v1159_v58  ;;  %v1169_v45 = vshrl.u32 %v4265_v3, %v1160_v26 }
  0xfe   :  { %v1103_v47 = vadd.s32 536870912, %v1102_v0  ;;  %v1153_v59 = vor.u32 8388608, %v1152_v51  ;;  %v1171_v63 = vshll.u32 %v4265_v3, %v1159_v58  ;;  %v1172_v17 = vshrl.u32 %v4275_v54, %v1160_v26 }
  0xff   :  { %v1174_v4 = vshll.u32 %v4275_v54, %v1159_v58  ;;  %v2123_v42 = vpop.eup %2122  ;;  %v1164_v12 = vor.u32 %v1163_v34, %v1162_v39  ;;  %v1167_v40 = vor.u32 %v1166_v9, %v1165_v10  ;;  %v1175_v16 = vshrl.u32 %v4276_v24, %v1160_v26 }
 0x100   :  { %v3359_v23 = vshrl.u32 %v1103_v47, 30  ;;  %vm724_vm11 = vcmp.lt.s32.totalorder %v3229_v21, 2  ;;  %vm831_vm14 = vcmp.eq.s32.totalorder %v3337_v56, 2  ;;  %v924_v43 = vsel %vm3306_vm8, %v2614_v31, %v921_v32 }
 0x101   :  { %v1021_v6 = vcvt.s32.f32 %v1014_v55  ;;  %v1173_v15 = vor.u32 %v1172_v17, %v1171_v63  ;;  %vm1177_vm15 = vcmp.lt.s32.totalorder %v1158_v50, 1  ;;  %v1019_v5 = vand.u32 2147483647, %v1018_v61 }
 0x102   :  { %v1105_v58 = vshll.u32 %v3359_v23, 30  ;;  %v1170_v57 = vor.u32 %v1169_v45, %v1168_v29  ;;  %vm1180_vm12 = vcmp.lt.s32.totalorder %v1158_v50, 4  ;;  %v829_v51 = vxor.u32 2147483648, %v2123_v42 }
 0x103   :  { %vm941_vm13 = vcmp.lt.s32.totalorder %v2634_v46, 0  ;;  %v1176_v39 = vor.u32 %v1175_v16, %v1174_v4  ;;  %vm1179_vm0 = vcmp.lt.s32.totalorder %v1158_v50, 3  ;;  %v1251_v34 = vand.u32 2139095040, %v2656_v22 }
 0x104   :  { %v3370_v10 = vsub.s32 %v1102_v0, %v1105_v58  ;;  %v1161_v9 = vshrl.u32 %v4256_v14, %v1160_v26  ;;  %vm1178_vm1 = vcmp.lt.s32.totalorder %v1158_v50, 2  ;;  %v1185_v32 = vsel %vm1177_vm15, %v1164_v12, %v1167_v40 }
 0x105   :  { %vm619_vm2 = vweird.f32 %v2562_v28  ;;  %vm722_vm3 = vweird.f32 %v2592_v7  ;;  %2124 = vcosq.f32 %v924_v43  ;;  %v1182_v55 = vsel %vm1180_vm12, %v1170_v57, 2102212464 }
 0x106   :  { %v1186_v61 = vsel %vm1180_vm12, %v1173_v15, 920167782  ;;  %v1193_v47 = vshll.u32 %v1153_v59, 8  ;;  %vm827_vm4 = vcmp.lt.s32.totalorder %v3337_v56, 2  ;;  %2126 = vsinq.f32 %v924_v43 }
 0x107   :  { %vm3381_vm6 = vcmp.le.f32.partialorder %v939_v44, 0.7853982  ;;  %v1022_v0 = vmul.f32 %v1021_v6, %v1019_v5  ;;  %v1108_v29 = vsub.s32 0, %v3370_v10  ;;  %v1187_v45 = vsel %vm1179_vm0, %v1170_v57, %v1186_v61 }
 0x108   :  { %v1188_v63 = vsel %vm1178_vm1, %v1185_v32, %v1187_v45  ;;  %v1189_v17 = vsel %vm1177_vm15, %v1167_v40, %v1170_v57  ;;  %v1190_v59 = vsel %vm1180_vm12, %v1176_v39, 1326507024  ;;  %v1252_v4 = vshrl.u32 %v1251_v34, 23 }
 0x109   :  { %v1025_v16 = vsub.s32 4, %v3246_v25  ;;  %v1961_v43 = vmin.u32 %v1108_v29, %v3370_v10  ;;  %v1181_v44 = vsel %vm1177_vm15, %v1161_v9, %v1164_v12  ;;  %v1183_v58 = vsel %vm1179_vm0, %v1167_v40, %v1182_v55 }
 0x10a   :  { %v1191_v6 = vsel %vm1179_vm0, %v1173_v15, %v1190_v59  ;;  %v3395_v5 = vmul.u32.u64.low %v1193_v47, %v1188_v63  ;;  %v3396_v37 = vmul.u32.u64.high %v1193_v47, %v1188_v63, %v3395_v5  ;;  %v1968_v32 = vadd.s32 4294967169, %v1252_v4 }
 0x10b   :  { %vm828_vm7 = vcmp.eq.s32.totalorder %v3337_v56, 0  ;;  %v1023_v57 = vxor.u32 2147483648, %v1022_v0  ;;  %v1110_v39 = vclz %v1961_v43  ;;  %v1192_v34 = vsel %vm1178_vm1, %v1189_v17, %v1191_v6 }
 0x10c   :  { %v1184_v61 = vsel %vm1178_vm1, %v1181_v44, %v1183_v58  ;;  %v3402_v29 = vmul.u32.u64.low %v1193_v47, %v1192_v34  ;;  %v3403_v45 = vmul.u32.u64.high %v1193_v47, %v1192_v34, %v3402_v29  ;;  %v1258_v12 = vadd.s32 1, %v1968_v32 }
 0x10d   :  { %v731_v40 = vsel %vm724_vm11, %v3331_v48, %v3335_v1  ;;  %v833_v15 = vsel %vm831_vm14, %v832_v60, %v2123_v42  ;;  %v925_v9 = vsel %vm3306_vm8, 0, %v3342_v27  ;;  %v1962_v50 = vadd.s32 4294967294, %v1110_v39 }
 0x10e   :  { %v830_v55 = vsel %vm828_vm7, %v3282_v19, %v829_v51  ;;  %v1026_v63 = vsel %vm941_vm13, %v1025_v16, %v3246_v25  ;;  %v1203_v17 = vadd.s32 1, %v3396_v37  ;;  %vm1259_vm5 = vcmp.gt.s32.totalorder %v1258_v12, 0 }
 0x10f   :  { %v1024_v21 = vsel %vm941_vm13, %v1023_v57, %v1022_v0  ;;  %vm1963_vm10 = vcmp.lt.s32.totalorder %v1962_v50, 0  ;;  %v1200_v48 = vmul.u32 %v1193_v47, %v1184_v61  ;;  %v1260_v1 = vsel %vm1259_vm5, %v1258_v12, 0  ;;  %v3423_v60 = vpop.eup %2124 }
 0x110   :  { %v3425_v33 = vand.u32 3, %v925_v9  ;;  %v1113_v27 = vsel %vm1963_vm10, 0, %v1962_v50  ;;  %vm1202_vm8 = vc.u32 %v3403_v45, %v3395_v5  ;;  %v1248_v19 = vand.u32 2147483647, %v2656_v22  ;;  %v3430_v25 = vpop.eup %2126 }
 0x111   :  { %v3435_v42 = vsel %vm619_vm2, nan, %v3320_v20  ;;  %v3439_v51 = vsel %vm722_vm3, nan, %v731_v40  ;;  %v1028_v47 = vsel %vm3381_vm6, 0, %v1026_v63  ;;  %v1118_v0 = vsub.s32 4294967266, %v1113_v27 }
 0x112   :  { %v3445_v59 = vsel %vm827_vm4, %v830_v55, %v833_v15  ;;  %v1027_v4 = vsel %vm3381_vm6, %v2634_v46, %v1024_v21  ;;  %v1204_v28 = vsel %vm1202_vm8, %v1203_v17, %v3396_v37  ;;  %v1262_v20 = vand.u32 31, %v1260_v1 }
 0x113   :  { %v1098_v7 = vadd.s32 %v3299_v36, %v3296_v53  ;;  %v1114_v16 = vsub.s32 32, %v1113_v27  ;;  %v1119_v43 = vadd.s32 127, %v1118_v0  ;;  %v1205_v44 = vadd.s32 %v1204_v28, %v1200_v48 }
 0x114   :  { %vm934_vm9 = vcmp.eq.s32.totalorder %v3425_v33, 2  ;;  %v935_v58 = vxor.u32 2147483648, %v3423_v60  ;;  %v3455_v56 = vand.u32 3, %v1028_v47  ;;  %v1255_v6 = vand.u32 8388607, %v1248_v19 }
 0x115   :  { %v1263_v26 = vsub.s32 32, %v1262_v20  ;;  %v932_v32 = vxor.u32 2147483648, %v3430_v25  ;;  %2128 = vcosq.f32 %v1027_v4  ;;  %v1206_v37 = vadd.s32 536870912, %v1205_v44 }
 0x116   :  { %v1265_v57 = vshll.u32 %v4256_v14, %v1262_v20  ;;  %v1115_v53 = vshll.u32 %v3370_v10, %v1113_v27  ;;  %v1268_v39 = vshll.u32 %v4261_v38, %v1262_v20  ;;  %vm931_vm11 = vcmp.eq.s32.totalorder %v3425_v33, 0 }
 0x117   :  { %v1266_v36 = vshrl.u32 %v4261_v38, %v1263_v26  ;;  %v1269_v34 = vshrl.u32 %v4263_v41, %v1263_v26  ;;  %v1116_v61 = vshrl.u32 %v1098_v7, %v1114_v16  ;;  %v1120_v29 = vshll.u32 %v1119_v43, 23 }
 0x118   :  { %v3466_v12 = vshrl.u32 %v1206_v37, 30  ;;  %v3468_v40 = vshrl.u32 %v1260_v1, 5  ;;  %v1271_v15 = vshll.u32 %v4263_v41, %v1262_v20  ;;  %v1272_v9 = vshrl.u32 %v4265_v3, %v1263_v26 }
 0x119   :  { %v1274_v10 = vshll.u32 %v4265_v3, %v1262_v20  ;;  %v1275_v50 = vshrl.u32 %v4275_v54, %v1263_v26  ;;  %2130 = vsinq.f32 %v1027_v4  ;;  %v1256_v63 = vor.u32 8388608, %v1255_v6 }
 0x11a   :  { %v1208_v55 = vshll.u32 %v3466_v12, 30  ;;  %v1267_v17 = vor.u32 %v1266_v36, %v1265_v57  ;;  %vm1044_vm14 = vcmp.lt.s32.totalorder %v2644_v52, 0  ;;  %v1270_v21 = vor.u32 %v1269_v34, %v1268_v39 }
 0x11b   :  { %v1276_v48 = vor.u32 %v1275_v50, %v1274_v10  ;;  %v1277_v1 = vshll.u32 %v4275_v54, %v1262_v20  ;;  %v1278_v27 = vshrl.u32 %v4276_v24, %v1263_v26  ;;  %v1117_v47 = vor.u32 %v1116_v61, %v1115_v53 }
 0x11c   :  { %v3478_v0 = vsub.s32 %v1205_v44, %v1208_v55  ;;  %vm1280_vm15 = vcmp.lt.s32.totalorder %v3468_v40, 1  ;;  %v1354_v28 = vand.u32 2139095040, %v2659_v11  ;;  %v1121_v4 = vor.u32 4788187, %v1120_v29 }
 0x11d   :  { %v1264_v7 = vshrl.u32 %v4256_v14, %v1263_v26  ;;  %v1273_v16 = vor.u32 %v1272_v9, %v1271_v15  ;;  %vm1283_vm12 = vcmp.lt.s32.totalorder %v3468_v40, 4  ;;  %vm930_vm13 = vcmp.lt.s32.totalorder %v3425_v33, 2 }
 0x11e   :  { %v1211_v43 = vsub.s32 0, %v3478_v0  ;;  %vm1281_vm0 = vcmp.lt.s32.totalorder %v3468_v40, 2  ;;  %vm1282_vm1 = vcmp.lt.s32.totalorder %v3468_v40, 3  ;;  %v3488_v20 = vshll.u32 %v1256_v63, 8 }
 0x11f   :  { %v1279_v44 = vor.u32 %v1278_v27, %v1277_v1  ;;  %v1285_v6 = vsel %vm1283_vm12, %v1273_v16, 2102212464  ;;  %v1288_v26 = vsel %vm1280_vm15, %v1267_v17, %v1270_v21  ;;  %v1289_v37 = vsel %vm1283_vm12, %v1276_v48, 920167782  ;;  %v2129_v57 = vpop.eup %2128 }
 0x120   :  { %v936_v53 = vsel %vm934_vm9, %v935_v58, %v3430_v25  ;;  %vm1037_vm2 = vcmp.eq.s32.totalorder %v3455_v56, 2  ;;  %v1128_v36 = vsub.s32 4, %v3359_v23  ;;  %v1965_v39 = vmin.u32 %v1211_v43, %v3478_v0 }
 0x121   :  { %v1355_v34 = vshrl.u32 %v1354_v28, 23  ;;  %vm1034_vm3 = vcmp.eq.s32.totalorder %v3455_v56, 0  ;;  %v1122_v61 = vand.u32 2147483647, %v1121_v4  ;;  %v1124_v29 = vcvt.s32.f32 %v1117_v47 }
 0x122   :  { %v1284_v15 = vsel %vm1280_vm15, %v1264_v7, %v1267_v17  ;;  %v1290_v9 = vsel %vm1282_vm1, %v1273_v16, %v1289_v37  ;;  %vm825_vm4 = vweird.f32 %v2608_v35  ;;  %vm928_vm6 = vweird.f32 %v2614_v31 }
 0x123   :  { %v4312_v25 = vand.u32 2147483647, %v2644_v52  ;;  %v1213_v10 = vclz %v1965_v39  ;;  %v1286_v50 = vsel %vm1282_vm1, %v1270_v21, %v1285_v6  ;;  %v1291_v55 = vsel %vm1281_vm0, %v1288_v26, %v1290_v9  ;;  %v2131_v28 = vpop.eup %2130 }
 0x124   :  { %v1292_v63 = vsel %vm1280_vm15, %v1270_v21, %v1273_v16  ;;  %v933_v17 = vsel %vm931_vm11, %v3423_v60, %v932_v32  ;;  %v1293_v1 = vsel %vm1283_vm12, %v1279_v44, 1326507024  ;;  %vm1033_vm5 = vcmp.lt.s32.totalorder %v3455_v56, 2 }
 0x125   :  { %vm3511_vm7 = vcmp.le.f32.partialorder %v4312_v25, 0.7853982  ;;  %v3527_v27 = vmul.u32.u64.low %v3488_v20, %v1291_v55  ;;  %v3528_v47 = vmul.u32.u64.high %v3488_v20, %v1291_v55, %v3527_v27  ;;  %v1129_v4 = vsel %vm1044_vm14, %v1128_v36, %v3359_v23 }
 0x126   :  { %v1966_v21 = vadd.s32 4294967294, %v1213_v10  ;;  %v1294_v7 = vsel %vm1282_vm1, %v1276_v48, %v1293_v1  ;;  %v1972_v60 = vadd.s32 4294967169, %v1355_v34  ;;  %v1125_v32 = vmul.f32 %v1124_v29, %v1122_v61 }
 0x127   :  { %v1201_v16 = vadd.s32 %v3395_v5, %v3403_v45  ;;  %v1287_v43 = vsel %vm1281_vm0, %v1284_v15, %v1286_v50  ;;  %v1295_v44 = vsel %vm1281_vm0, %v1292_v63, %v1294_v7  ;;  %v1035_v37 = vxor.u32 2147483648, %v2131_v28 }
 0x128   :  { %vm1967_vm10 = vcmp.lt.s32.totalorder %v1966_v21, 0  ;;  %v3544_v6 = vmul.u32.u64.low %v3488_v20, %v1295_v44  ;;  %v3545_v26 = vmul.u32.u64.high %v3488_v20, %v1295_v44, %v3544_v6  ;;  %v1361_v23 = vadd.s32 1, %v1972_v60 }
 0x129   :  { %v1038_v36 = vxor.u32 2147483648, %v2129_v57  ;;  %v1216_v48 = vsel %vm1967_vm10, 0, %v1966_v21  ;;  %v1306_v39 = vadd.s32 1, %v3528_v47  ;;  %v1303_v5 = vmul.u32 %v3488_v20, %v1287_v43 }
 0x12a   :  { %v1217_v34 = vsub.s32 32, %v1216_v48  ;;  %v1221_v61 = vsub.s32 4294967266, %v1216_v48  ;;  %vm1362_vm8 = vcmp.gt.s32.totalorder %v1361_v23, 0  ;;  %v937_v45 = vsel %vm930_vm13, %v933_v17, %v936_v53 }
 0x12b   :  { %v1126_v40 = vxor.u32 2147483648, %v1125_v32  ;;  %v1351_v29 = vand.u32 2147483647, %v2659_v11  ;;  %v1363_v15 = vsel %vm1362_vm8, %v1361_v23, 0  ;;  %v1218_v9 = vshll.u32 %v3478_v0, %v1216_v48 }
 0x12c   :  { %v1219_v25 = vshrl.u32 %v1201_v16, %v1217_v34  ;;  %v1222_v10 = vadd.s32 127, %v1221_v61  ;;  %vm1305_vm9 = vc.u32 %v3545_v26, %v3527_v27  ;;  %v1039_v50 = vsel %vm1037_vm2, %v1038_v36, %v2131_v28 }
 0x12d   :  { %v1131_v20 = vsel %vm3511_vm7, 0, %v1129_v4  ;;  %vm1147_vm11 = vcmp.lt.s32.totalorder %v2647_v30, 0  ;;  %v1307_v33 = vsel %vm1305_vm9, %v1306_v39, %v3528_v47  ;;  %v1365_v53 = vand.u32 31, %v1363_v15 }
 0x12e   :  { %v1036_v55 = vsel %vm1034_vm3, %v2129_v57, %v1035_v37  ;;  %v1223_v0 = vshll.u32 %v1222_v10, 23  ;;  %v1308_v63 = vadd.s32 %v1307_v33, %v1303_v5  ;;  %v1457_v17 = vand.u32 2139095040, %v2662_v18 }
 0x12f   :  { %v3567_v1 = vsel %vm825_vm4, nan, %v3445_v59  ;;  %v3571_v28 = vsel %vm928_vm6, nan, %v937_v45  ;;  %v1127_v47 = vsel %vm1044_vm14, %v1126_v40, %v1125_v32  ;;  %v1366_v4 = vsub.s32 32, %v1365_v53 }
 0x130   :  { %v3575_v21 = vand.u32 3, %v1131_v20  ;;  %v1220_v57 = vor.u32 %v1219_v25, %v1218_v9  ;;  %v1309_v7 = vadd.s32 536870912, %v1308_v63  ;;  %v1358_v60 = vand.u32 8388607, %v1351_v29 }
 0x131   :  { %v3581_v35 = vsel %vm1033_vm5, %v1036_v55, %v1039_v50  ;;  %v1224_v59 = vor.u32 4788187, %v1223_v0  ;;  %v1231_v31 = vsub.s32 4, %v3466_v12  ;;  %v1454_v16 = vand.u32 2147483647, %v2662_v18 }
 0x132   :  { %v3588_v32 = vsel %vm3511_vm7, %v2644_v52, %v1127_v47  ;;  %v3590_v43 = vshrl.u32 %v1309_v7, 30  ;;  %v1364_v44 = vshrl.u32 %v1363_v15, 5  ;;  %v1458_v6 = vshrl.u32 %v1457_v17, 23 }
 0x133   :  { %v1368_v23 = vshll.u32 %v4256_v14, %v1365_v53  ;;  %v1369_v56 = vshrl.u32 %v4261_v38, %v1366_v4  ;;  %v1371_v37 = vshll.u32 %v4261_v38, %v1365_v53  ;;  %v1372_v36 = vshrl.u32 %v4263_v41, %v1366_v4 }
 0x134   :  { %v1227_v48 = vcvt.s32.f32 %v1220_v57  ;;  %v1311_v39 = vshll.u32 %v3590_v43, 30  ;;  %v1374_v34 = vshll.u32 %v4263_v41, %v1365_v53  ;;  %v1375_v58 = vshrl.u32 %v4265_v3, %v1366_v4 }
 0x135   :  { %v1225_v61 = vand.u32 2147483647, %v1224_v59  ;;  %v1377_v5 = vshll.u32 %v4265_v3, %v1365_v53  ;;  %v1378_v45 = vshrl.u32 %v4275_v54, %v1366_v4  ;;  %v1380_v40 = vshll.u32 %v4275_v54, %v1365_v53 }
 0x136   :  { %v3605_v15 = vsel %vm1147_vm11, %v1231_v31, %v3466_v12  ;;  %v3607_v9 = vsub.s32 %v1308_v63, %v1311_v39  ;;  %v1359_v25 = vor.u32 8388608, %v1358_v60  ;;  %v1381_v10 = vshrl.u32 %v4276_v24, %v1366_v4 }
 0x137   :  { %2132 = vcosq.f32 %v3588_v32  ;;  %v1367_v50 = vshrl.u32 %v4256_v14, %v1366_v4  ;;  %v1370_v20 = vor.u32 %v1369_v56, %v1368_v23  ;;  %v1373_v33 = vor.u32 %v1372_v36, %v1371_v37 }
 0x138   :  { %vm1031_vm14 = vweird.f32 %v2634_v46  ;;  %v4315_v53 = vand.u32 2147483647, %v2647_v30  ;;  %v1314_v12 = vsub.s32 0, %v3607_v9  ;;  %v1376_v0 = vor.u32 %v1375_v58, %v1374_v34 }
 0x139   :  { %v1379_v63 = vor.u32 %v1378_v45, %v1377_v5  ;;  %vm1383_vm12 = vcmp.lt.s32.totalorder %v1364_v44, 1  ;;  %v1228_v17 = vmul.f32 %v1227_v48, %v1225_v61  ;;  %v1382_v47 = vor.u32 %v1381_v10, %v1380_v40 }
 0x13a   :  { %vm3615_vm15 = vcmp.le.f32.partialorder %v4315_v53, 0.7853982  ;;  %vm1386_vm13 = vcmp.lt.s32.totalorder %v1364_v44, 4  ;;  %v1976_v57 = vadd.s32 4294967169, %v1458_v6  ;;  %v1304_v4 = vadd.s32 %v3527_v27, %v3545_v26 }
 0x13b   :  { %v1969_v7 = vmin.u32 %v1314_v12, %v3607_v9  ;;  %vm1385_vm0 = vcmp.lt.s32.totalorder %v1364_v44, 3  ;;  %v1399_v60 = vshll.u32 %v1359_v25, 8  ;;  %vm1384_vm1 = vcmp.lt.s32.totalorder %v1364_v44, 2 }
 0x13c   :  { %v1387_v59 = vsel %vm1383_vm12, %v1367_v50, %v1370_v20  ;;  %v1388_v31 = vsel %vm1386_vm13, %v1376_v0, 2102212464  ;;  %v1391_v23 = vsel %vm1383_vm12, %v1370_v20, %v1373_v33  ;;  %v1392_v36 = vsel %vm1386_vm13, %v1379_v63, 920167782 }
 0x13d   :  { %v1316_v56 = vclz %v1969_v7  ;;  %v1389_v37 = vsel %vm1385_vm0, %v1373_v33, %v1388_v31  ;;  %v1395_v6 = vsel %vm1383_vm12, %v1373_v33, %v1376_v0  ;;  %v1229_v48 = vxor.u32 2147483648, %v1228_v17 }
 0x13e   :  { %v1393_v27 = vsel %vm1385_vm0, %v1376_v0, %v1392_v36  ;;  %v1396_v26 = vsel %vm1386_vm13, %v1382_v47, 1326507024  ;;  %v1464_v39 = vadd.s32 1, %v1976_v57  ;;  %v1390_v58 = vsel %vm1384_vm1, %v1387_v59, %v1389_v37 }
 0x13f   :  { %v1970_v34 = vadd.s32 4294967294, %v1316_v56  ;;  %v1394_v61 = vsel %vm1384_vm1, %v1391_v23, %v1393_v27  ;;  %v1397_v5 = vsel %vm1385_vm0, %v1379_v63, %v1396_v26  ;;  %v1234_v53 = vsel %vm3615_vm15, 0, %v3605_v15 }
 0x140   :  { %v1398_v45 = vsel %vm1384_vm1, %v1395_v6, %v1397_v5  ;;  %v3635_v40 = vmul.u32.u64.low %v1399_v60, %v1394_v61  ;;  %v3636_v25 = vmul.u32.u64.high %v1399_v60, %v1394_v61, %v3635_v40  ;;  %vm1465_vm2 = vcmp.gt.s32.totalorder %v1464_v39, 0 }
 0x141   :  { %vm1971_vm3 = vcmp.lt.s32.totalorder %v1970_v34, 0  ;;  %v3639_v10 = vmul.u32.u64.low %v1399_v60, %v1398_v45  ;;  %v3640_v50 = vmul.u32.u64.high %v1399_v60, %v1398_v45, %v3639_v10  ;;  %v1466_v20 = vsel %vm1465_vm2, %v1464_v39, 0  ;;  %v3642_v33 = vpop.eup %2132 }
 0x142   :  { %v1319_v12 = vsel %vm1971_vm3, 0, %v1970_v34  ;;  %v3649_v44 = vand.u32 8388607, %v1454_v16  ;;  %v1468_v0 = vand.u32 31, %v1466_v20  ;;  %v1406_v7 = vmul.u32 %v1399_v60, %v1390_v58 }
 0x143   :  { %v1320_v63 = vsub.s32 32, %v1319_v12  ;;  %v1321_v47 = vshll.u32 %v3607_v9, %v1319_v12  ;;  %v1324_v57 = vsub.s32 4294967266, %v1319_v12  ;;  %v3655_v59 = vsel %vm1031_vm14, nan, %v3581_v35 }
 0x144   :  { %2134 = vsinq.f32 %v3588_v32  ;;  %v1409_v15 = vadd.s32 1, %v3636_v25  ;;  %v1469_v31 = vsub.s32 32, %v1468_v0  ;;  %v1230_v23 = vsel %vm1147_vm11, %v1229_v48, %v1228_v17 }
 0x145   :  { %v1322_v56 = vshrl.u32 %v1304_v4, %v1320_v63  ;;  %v1325_v37 = vadd.s32 127, %v1324_v57  ;;  %vm1408_vm4 = vc.u32 %v3640_v50, %v3635_v40  ;;  %v1141_v9 = vxor.u32 2147483648, %v3642_v33 }
 0x146   :  { %v3664_v60 = vand.u32 3, %v1234_v53  ;;  %vm1250_vm6 = vcmp.lt.s32.totalorder %v2656_v22, 0  ;;  %v1410_v46 = vsel %vm1408_vm4, %v1409_v15, %v3636_v25  ;;  %v1462_v35 = vor.u32 8388608, %v3649_v44 }
 0x147   :  { %vm3671_vm7 = vcmp.le.f32.partialorder %v1248_v19, 0.7853982  ;;  %v1323_v17 = vor.u32 %v1322_v56, %v1321_v47  ;;  %v1326_v4 = vshll.u32 %v1325_v37, 23  ;;  %v1334_v36 = vsub.s32 4, %v3590_v43 }
 0x148   :  { %v1411_v6 = vadd.s32 %v1410_v46, %v1406_v7  ;;  %v1233_v48 = vsel %vm3615_vm15, %v2647_v30, %v1230_v23  ;;  %v1471_v27 = vshll.u32 %v4256_v14, %v1468_v0  ;;  %v1472_v26 = vshrl.u32 %v4261_v38, %v1469_v31 }
 0x149   :  { %v1474_v39 = vshll.u32 %v4261_v38, %v1468_v0  ;;  %vm1140_vm5 = vcmp.eq.s32.totalorder %v3575_v21, 2  ;;  %v1327_v19 = vor.u32 4788187, %v1326_v4  ;;  %v1330_v34 = vcvt.s32.f32 %v1323_v17 }
 0x14a   :  { %v1412_v58 = vadd.s32 536870912, %v1411_v6  ;;  %v1475_v61 = vshrl.u32 %v4263_v41, %v1469_v31  ;;  %v1467_v5 = vshrl.u32 %v1466_v20, 5  ;;  %v1477_v45 = vshll.u32 %v4263_v41, %v1468_v0 }
 0x14b   :  { %v1478_v25 = vshrl.u32 %v4265_v3, %v1469_v31  ;;  %v1480_v55 = vshll.u32 %v4265_v3, %v1468_v0  ;;  %vm1137_vm10 = vcmp.eq.s32.totalorder %v3575_v21, 0  ;;  %2136 = vcosq.f32 %v1233_v48 }
 0x14c   :  { %v1328_v10 = vand.u32 2147483647, %v1327_v19  ;;  %v3688_v53 = vshrl.u32 %v1412_v58, 30  ;;  %v1481_v12 = vshrl.u32 %v4275_v54, %v1469_v31  ;;  %2138 = vsinq.f32 %v1233_v48 }
 0x14d   :  { %v1473_v44 = vor.u32 %v1472_v26, %v1471_v27  ;;  %v1483_v63 = vshll.u32 %v4275_v54, %v1468_v0  ;;  %v1484_v20 = vshrl.u32 %v4276_v24, %v1469_v31  ;;  %v1476_v7 = vor.u32 %v1475_v61, %v1474_v39 }
 0x14e   :  { %v1331_v47 = vmul.f32 %v1330_v34, %v1328_v10  ;;  %v1414_v57 = vshll.u32 %v3688_v53, 30  ;;  %v1482_v15 = vor.u32 %v1481_v12, %v1480_v55  ;;  %v2135_v23 = vpop.eup %2134  ;;  %v1470_v56 = vshrl.u32 %v4256_v14, %v1469_v31 }
 0x14f   :  { %v1479_v37 = vor.u32 %v1478_v25, %v1477_v45  ;;  %vm1486_vm8 = vcmp.lt.s32.totalorder %v1467_v5, 1  ;;  %vm1489_vm9 = vcmp.lt.s32.totalorder %v1467_v5, 4  ;;  %v1335_v17 = vsel %vm1250_vm6, %v1334_v36, %v3590_v43 }
 0x150   :  { %v1332_v46 = vxor.u32 2147483648, %v1331_v47  ;;  %v3698_v4 = vsub.s32 %v1411_v6, %v1414_v57  ;;  %vm1488_vm11 = vcmp.lt.s32.totalorder %v1467_v5, 3  ;;  %vm1136_vm14 = vcmp.lt.s32.totalorder %v3575_v21, 2 }
 0x151   :  { %v1485_v0 = vor.u32 %v1484_v20, %v1483_v63  ;;  %v1491_v48 = vsel %vm1489_vm9, %v1479_v37, 2102212464  ;;  %v1495_v27 = vsel %vm1489_vm9, %v1482_v15, 920167782  ;;  %v3703_v26 = vshll.u32 %v1462_v35, 8 }
 0x152   :  { %v1333_v31 = vsel %vm1250_vm6, %v1332_v46, %v1331_v47  ;;  %v1417_v39 = vsub.s32 0, %v3698_v4  ;;  %vm1487_vm15 = vcmp.lt.s32.totalorder %v1467_v5, 2  ;;  %v1494_v43 = vsel %vm1486_vm8, %v1473_v44, %v1476_v7 }
 0x153   :  { %v1138_v36 = vxor.u32 2147483648, %v2135_v23  ;;  %v1336_v6 = vsel %vm3671_vm7, %v2656_v22, %v1333_v31  ;;  %v1490_v19 = vsel %vm1486_vm8, %v1470_v56, %v1473_v44  ;;  %v1496_v34 = vsel %vm1488_vm11, %v1479_v37, %v1495_v27  ;;  %v4322_v27 = vld [vmem:[#allocation3_spill] sm:$0xff] }
 0x154   :  { %vm1240_vm12 = vcmp.eq.s32.totalorder %v3664_v60, 0  ;;  %vm1243_vm13 = vcmp.eq.s32.totalorder %v3664_v60, 2  ;;  %2140 = vcosq.f32 %v1336_v6  ;;  %vm1353_vm0 = vcmp.lt.s32.totalorder %v2659_v11, 0 }
 0x155   :  { %v1973_v35 = vmin.u32 %v1417_v39, %v3698_v4  ;;  %v1492_v58 = vsel %vm1488_vm11, %v1476_v7, %v1491_v48  ;;  %v1498_v61 = vsel %vm1486_vm8, %v1476_v7, %v1479_v37  ;;  %v1142_v45 = vsel %vm1140_vm5, %v1141_v9, %v2135_v23  ;;  %v2137_v12 = vpop.eup %2136 }
 0x156   :  { %v1337_v25 = vsel %vm3671_vm7, 0, %v1335_v17  ;;  %v1497_v55 = vsel %vm1487_vm15, %v1494_v43, %v1496_v34  ;;  %v1499_v10 = vsel %vm1489_vm9, %v1485_v0, 1326507024  ;;  %v2139_v57 = vpop.eup %2138  ;;  %v1139_v9 = vsel %vm1137_vm10, %v3642_v33, %v1138_v36 }
 0x157   :  { %v1419_v44 = vclz %v1973_v35  ;;  %v1500_v63 = vsel %vm1488_vm11, %v1482_v15, %v1499_v10  ;;  %v3730_v20 = vmul.u32.u64.low %v3703_v26, %v1497_v55  ;;  %v3731_v47 = vmul.u32.u64.high %v3703_v26, %v1497_v55, %v3730_v20 }
 0x158   :  { %2142 = vsinq.f32 %v1336_v6  ;;  %vm3738_vm1 = vcmp.le.f32.partialorder %v1351_v29, 0.7853982  ;;  %v1493_v7 = vsel %vm1487_vm15, %v1490_v19, %v1492_v58  ;;  %v1501_v15 = vsel %vm1487_vm15, %v1498_v61, %v1500_v63 }
 0x159   :  { %vm1239_vm2 = vcmp.lt.s32.totalorder %v3664_v60, 2  ;;  %v1974_v23 = vadd.s32 4294967294, %v1419_v44  ;;  %v3746_v56 = vmul.u32.u64.low %v3703_v26, %v1501_v15  ;;  %v3747_v37 = vmul.u32.u64.high %v3703_v26, %v1501_v15, %v3746_v56 }
 0x15a   :  { %v1560_v33 = vand.u32 2139095040, %v2733_v8  ;;  %v3750_v46 = vand.u32 3, %v1337_v25  ;;  %v1407_v29 = vadd.s32 %v3635_v40, %v3640_v50  ;;  %v1437_v17 = vsub.s32 4, %v3688_v53 }
 0x15b   :  { %v1557_v0 = vand.u32 2147483647, %v2733_v8  ;;  %vm1975_vm3 = vcmp.lt.s32.totalorder %v1974_v23, 0  ;;  %v1512_v5 = vadd.s32 1, %v3731_v47  ;;  %v1663_v31 = vand.u32 2139095040, %v4322_v27 }
 0x15c   :  { %v1561_v48 = vshrl.u32 %v1560_v33, 23  ;;  %v1241_v39 = vxor.u32 2147483648, %v2139_v57  ;;  %v1244_v43 = vxor.u32 2147483648, %v2137_v12  ;;  %v1422_v36 = vsel %vm1975_vm3, 0, %v1974_v23 }
 0x15d   :  { %v1509_v6 = vmul.u32 %v3703_v26, %v1493_v7  ;;  %v3761_v19 = vsel %vm1136_vm14, %v1139_v9, %v1142_v45  ;;  %v1423_v40 = vsub.s32 32, %v1422_v36  ;;  %v1424_v50 = vshll.u32 %v3698_v4, %v1422_v36 }
 0x15e   :  { %v1427_v34 = vsub.s32 4294967266, %v1422_v36  ;;  %v1438_v35 = vsel %vm1353_vm0, %v1437_v17, %v3688_v53  ;;  %vm1511_vm4 = vc.u32 %v3747_v37, %v3730_v20  ;;  %v1980_v58 = vadd.s32 4294967169, %v1561_v48  ;;  %v2141_v25 = vpop.eup %2140 }
 0x15f   :  { %v1564_v61 = vand.u32 8388607, %v1557_v0  ;;  %vm1343_vm6 = vcmp.eq.s32.totalorder %v3750_v46, 0  ;;  %v1425_v21 = vshrl.u32 %v1407_v29, %v1423_v40  ;;  %v1513_v45 = vsel %vm1511_vm4, %v1512_v5, %v3731_v47 }
 0x160   :  { %v1428_v26 = vadd.s32 127, %v1427_v34  ;;  %v1664_v55 = vshrl.u32 %v1663_v31, 23  ;;  %v1242_v4 = vsel %vm1240_vm12, %v2137_v12, %v1241_v39  ;;  %v1245_v53 = vsel %vm1243_vm13, %v1244_v43, %v2139_v57 }
 0x161   :  { %v1514_v10 = vadd.s32 %v1513_v45, %v1509_v6  ;;  %v1567_v44 = vadd.s32 1, %v1980_v58  ;;  %v1426_v63 = vor.u32 %v1425_v21, %v1424_v50  ;;  %v1440_v7 = vsel %vm3738_vm1, 0, %v1438_v35 }
 0x162   :  { %v1429_v9 = vshll.u32 %v1428_v26, 23  ;;  %v1660_v15 = vand.u32 2147483647, %v4322_v27  ;;  %v2143_v23 = vpop.eup %2142  ;;  %v1347_v56 = vxor.u32 2147483648, %v2141_v25  ;;  %v1565_v47 = vor.u32 8388608, %v1564_v61 }
 0x163   :  { %v1515_v33 = vadd.s32 536870912, %v1514_v10  ;;  %vm1568_vm7 = vcmp.gt.s32.totalorder %v1567_v44, 0  ;;  %v1433_v17 = vcvt.s32.f32 %v1426_v63  ;;  %v1984_v5 = vadd.s32 4294967169, %v1664_v55 }
 0x164   :  { %v1430_v29 = vor.u32 4788187, %v1429_v9  ;;  %v1569_v12 = vsel %vm1568_vm7, %v1567_v44, 0  ;;  %v3781_v57 = vsel %vm1239_vm2, %v1242_v4, %v1245_v53  ;;  %vm1346_vm5 = vcmp.eq.s32.totalorder %v3750_v46, 2 }
 0x165   :  { %v3784_v48 = vshrl.u32 %v1515_v33, 30  ;;  %v1571_v31 = vand.u32 31, %v1569_v12  ;;  %v3786_v43 = vand.u32 3, %v1440_v7  ;;  %v3789_v36 = vadd.s32 %v3730_v20, %v3747_v37 }
 0x166   :  { %v1431_v39 = vand.u32 2147483647, %v1430_v29  ;;  %v3793_v6 = vand.u32 8388607, %v1660_v15  ;;  %v1344_v40 = vxor.u32 2147483648, %v2143_v23  ;;  %v3796_v34 = vshll.u32 %v1565_v47, 8 }
 0x167   :  { %v1517_v60 = vshll.u32 %v3784_v48, 30  ;;  %v1572_v50 = vsub.s32 32, %v1571_v31  ;;  %v3798_v35 = vsel %vm1346_vm5, %v1347_v56, %v2143_v23  ;;  %v1574_v61 = vshll.u32 %v4256_v14, %v1571_v31 }
 0x168   :  { %v1434_v58 = vmul.f32 %v1433_v17, %v1431_v39  ;;  %v1670_v21 = vadd.s32 1, %v1984_v5  ;;  %v1577_v37 = vshll.u32 %v4261_v38, %v1571_v31  ;;  %v1580_v45 = vshll.u32 %v4263_v41, %v1571_v31 }
 0x169   :  { %v3801_v26 = vsub.s32 %v1514_v10, %v1517_v60  ;;  %v1575_v20 = vshrl.u32 %v4261_v38, %v1572_v50  ;;  %v1578_v4 = vshrl.u32 %v4263_v41, %v1572_v50  ;;  %v1581_v53 = vshrl.u32 %v4265_v3, %v1572_v50 }
 0x16a   :  { %v1435_v55 = vxor.u32 2147483648, %v1434_v58  ;;  %v1583_v44 = vshll.u32 %v4265_v3, %v1571_v31  ;;  %v1345_v63 = vsel %vm1343_vm6, %v2141_v25, %v1344_v40  ;;  %v1570_v10 = vshrl.u32 %v1569_v12, 5 }
 0x16b   :  { %v1520_v9 = vsub.s32 0, %v3801_v26  ;;  %v1584_v7 = vshrl.u32 %v4275_v54, %v1572_v50  ;;  %vm1134_vm10 = vweird.f32 %v2644_v52  ;;  %v1573_v56 = vshrl.u32 %v4256_v14, %v1572_v50 }
 0x16c   :  { %v1436_v23 = vsel %vm1353_vm0, %v1435_v55, %v1434_v58  ;;  %v1586_v33 = vshll.u32 %v4275_v54, %v1571_v31  ;;  %vm1671_vm8 = vcmp.gt.s32.totalorder %v1670_v21, 0  ;;  %vm1237_vm9 = vweird.f32 %v2647_v30 }
 0x16d   :  { %vm1342_vm11 = vcmp.lt.s32.totalorder %v3750_v46, 2  ;;  %v1439_v25 = vsel %vm3738_vm1, %v2659_v11, %v1436_v23  ;;  %v1977_v47 = vmin.u32 %v1520_v9, %v3801_v26  ;;  %v1576_v29 = vor.u32 %v1575_v20, %v1574_v61 }
 0x16e   :  { %v1579_v17 = vor.u32 %v1578_v4, %v1577_v37  ;;  %2144 = vcosq.f32 %v1439_v25  ;;  %v1582_v12 = vor.u32 %v1581_v53, %v1580_v45  ;;  %v1585_v5 = vor.u32 %v1584_v7, %v1583_v44 }
 0x16f   :  { %v1587_v39 = vshrl.u32 %v4276_v24, %v1572_v50  ;;  %2146 = vsinq.f32 %v1439_v25  ;;  %v1522_v31 = vclz %v1977_v47  ;;  %vm1589_vm14 = vcmp.lt.s32.totalorder %v1570_v10, 1 }
 0x170   :  { %vm1590_vm15 = vcmp.lt.s32.totalorder %v1570_v10, 2  ;;  %vm1340_vm12 = vweird.f32 %v2656_v22  ;;  %vm1456_vm13 = vcmp.lt.s32.totalorder %v2662_v18, 0  ;;  %vm1591_vm0 = vcmp.lt.s32.totalorder %v1570_v10, 3 }
 0x171   :  { %v1588_v40 = vor.u32 %v1587_v39, %v1586_v33  ;;  %vm1592_vm1 = vcmp.lt.s32.totalorder %v1570_v10, 4  ;;  %v1593_v32 = vsel %vm1589_vm14, %v1573_v56, %v1576_v29  ;;  %v1978_v60 = vadd.s32 4294967294, %v1522_v31 }
 0x172   :  { %v1594_v58 = vsel %vm1592_vm1, %v1582_v12, 2102212464  ;;  %v1597_v61 = vsel %vm1589_vm14, %v1576_v29, %v1579_v17  ;;  %v1598_v20 = vsel %vm1592_vm1, %v1585_v5, 920167782  ;;  %v1601_v55 = vsel %vm1589_vm14, %v1579_v17, %v1582_v12 }
 0x173   :  { %v1595_v37 = vsel %vm1591_vm0, %v1579_v17, %v1594_v58  ;;  %v1599_v45 = vsel %vm1591_vm0, %v1582_v12, %v1598_v20  ;;  %v1602_v50 = vsel %vm1592_vm1, %v1588_v40, 1326507024  ;;  %vm3829_vm2 = vcmp.le.f32.partialorder %v1454_v16, 0.7853982 }
 0x174   :  { %vm1979_vm3 = vcmp.lt.s32.totalorder %v1978_v60, 0  ;;  %v1540_v53 = vsub.s32 4, %v3784_v48  ;;  %v1600_v44 = vsel %vm1590_vm15, %v1597_v61, %v1599_v45  ;;  %v1603_v9 = vsel %vm1591_vm0, %v1585_v5, %v1602_v50 }
 0x175   :  { %v1525_v7 = vsel %vm1979_vm3, 0, %v1978_v60  ;;  %v1604_v23 = vsel %vm1590_vm15, %v1601_v55, %v1603_v9  ;;  %v3837_v56 = vmul.u32.u64.low %v3796_v34, %v1600_v44  ;;  %v3838_v33 = vmul.u32.u64.high %v3796_v34, %v1600_v44, %v3837_v56 }
 0x176   :  { %v1526_v25 = vsub.s32 32, %v1525_v7  ;;  %v1527_v16 = vshll.u32 %v3801_v26, %v1525_v7  ;;  %v1530_v47 = vsub.s32 4294967266, %v1525_v7  ;;  %v1596_v29 = vsel %vm1590_vm15, %v1593_v32, %v1595_v37 }
 0x177   :  { %v3844_v17 = vmul.u32.u64.low %v3796_v34, %v1604_v23  ;;  %v3845_v12 = vmul.u32.u64.high %v3796_v34, %v1604_v23, %v3844_v17  ;;  %v1668_v5 = vor.u32 8388608, %v3793_v6  ;;  %v1672_v39 = vsel %vm1671_vm8, %v1670_v21, 0 }
 0x178   :  { %v3852_v31 = vsel %vm1134_vm10, nan, %v3761_v19  ;;  %v1528_v40 = vshrl.u32 %v3789_v36, %v1526_v25  ;;  %v1531_v60 = vadd.s32 127, %v1530_v47  ;;  %v1674_v26 = vand.u32 31, %v1672_v39  ;;  %v2145_v58 = vpop.eup %2144  ;;  %v4325_v47 = vld [vmem:[#allocation20_spill] sm:$0xff] }
 0x179   :  { %v3858_v10 = vsel %vm1237_vm9, nan, %v3781_v57  ;;  %v1349_v6 = vsel %vm1342_vm11, %v1345_v63, %v3798_v35  ;;  %v1612_v21 = vmul.u32 %v3796_v34, %v1596_v29  ;;  %v1615_v52 = vadd.s32 1, %v3838_v33  ;;  %v2147_v19 = vpop.eup %2146 }
 0x17a   :  { %v1529_v32 = vor.u32 %v1528_v40, %v1527_v16  ;;  %v1532_v61 = vshll.u32 %v1531_v60, 23  ;;  %v3868_v36 = vsel %vm1456_vm13, %v1540_v53, %v3784_v48  ;;  %v1675_v20 = vsub.s32 32, %v1674_v26 }
 0x17b   :  { %vm1446_vm4 = vcmp.eq.s32.totalorder %v3786_v43, 0  ;;  %vm1449_vm6 = vcmp.eq.s32.totalorder %v3786_v43, 2  ;;  %vm1614_vm7 = vc.u32 %v3845_v12, %v3837_v56  ;;  %v3874_v30 = vshll.u32 %v1668_v5, 8 }
 0x17c   :  { %v3878_v46 = vsel %vm1340_vm12, nan, %v1349_v6  ;;  %v1533_v57 = vor.u32 4788187, %v1532_v61  ;;  %v1536_v34 = vcvt.s32.f32 %v1529_v32  ;;  %v1616_v35 = vsel %vm1614_vm7, %v1615_v52, %v3838_v33 }
 0x17d   :  { %v1450_v48 = vxor.u32 2147483648, %v2145_v58  ;;  %v1543_v63 = vsel %vm3829_vm2, 0, %v3868_v36  ;;  %v1617_v37 = vadd.s32 %v1616_v35, %v1612_v21  ;;  %v1673_v45 = vshrl.u32 %v1672_v39, 5 }
 0x17e   :  { %vm1445_vm5 = vcmp.lt.s32.totalorder %v3786_v43, 2  ;;  %v1447_v55 = vxor.u32 2147483648, %v2147_v19  ;;  %v1534_v50 = vand.u32 2147483647, %v1533_v57  ;;  %v1677_v53 = vshll.u32 %v4256_v14, %v1674_v26 }
 0x17f   :  { %v1678_v22 = vshrl.u32 %v4261_v38, %v1675_v20  ;;  %v1618_v44 = vadd.s32 536870912, %v1617_v37  ;;  %v1680_v9 = vshll.u32 %v4261_v38, %v1674_v26  ;;  %v1681_v7 = vshrl.u32 %v4263_v41, %v1675_v20 }
 0x180   :  { %v1683_v23 = vshll.u32 %v4263_v41, %v1674_v26  ;;  %v1537_v33 = vmul.f32 %v1536_v34, %v1534_v50  ;;  %v1684_v25 = vshrl.u32 %v4265_v3, %v1675_v20  ;;  %v1686_v16 = vshll.u32 %v4265_v3, %v1674_v26 }
 0x181   :  { %v1766_v29 = vand.u32 2139095040, %v4325_v47  ;;  %vm1559_vm10 = vcmp.lt.s32.totalorder %v2733_v8, 0  ;;  %v1619_v17 = vshrl.u32 %v1618_v44, 30  ;;  %v1687_v5 = vshrl.u32 %v4275_v54, %v1675_v20 }
 0x182   :  { %v1689_v39 = vshll.u32 %v4275_v54, %v1674_v26  ;;  %v1690_v40 = vshrl.u32 %v4276_v24, %v1675_v20  ;;  %v1448_v60 = vsel %vm1446_vm4, %v2145_v58, %v1447_v55  ;;  %v1451_v6 = vsel %vm1449_vm6, %v1450_v48, %v2147_v19 }
 0x183   :  { %v1538_v21 = vxor.u32 2147483648, %v1537_v33  ;;  %v1676_v52 = vshrl.u32 %v4256_v14, %v1675_v20  ;;  %v1620_v32 = vshll.u32 %v1619_v17, 30  ;;  %v1679_v61 = vor.u32 %v1678_v22, %v1677_v53 }
 0x184   :  { %v1682_v36 = vor.u32 %v1681_v7, %v1680_v9  ;;  %v1685_v57 = vor.u32 %v1684_v25, %v1683_v23  ;;  %vm1443_vm8 = vweird.f32 %v2659_v11  ;;  %vm3907_vm9 = vcmp.le.f32.partialorder %v1557_v0, 0.7853982 }
 0x185   :  { %v1539_v26 = vsel %vm1456_vm13, %v1538_v21, %v1537_v33  ;;  %v1688_v58 = vor.u32 %v1687_v5, %v1686_v16  ;;  %v1691_v19 = vor.u32 %v1690_v40, %v1689_v39  ;;  %vm1695_vm11 = vcmp.lt.s32.totalorder %v1673_v45, 4 }
 0x186   :  { %v1542_v20 = vsel %vm3829_vm2, %v2662_v18, %v1539_v26  ;;  %v3914_v35 = vsub.s32 %v1617_v37, %v1620_v32  ;;  %vm1692_vm14 = vcmp.lt.s32.totalorder %v1673_v45, 1  ;;  %v1697_v48 = vsel %vm1695_vm11, %v1685_v57, 2102212464 }
 0x187   :  { %2148 = vcosq.f32 %v1542_v20  ;;  %v1643_v55 = vsub.s32 4, %v1619_v17  ;;  %vm1693_vm15 = vcmp.lt.s32.totalorder %v1673_v45, 2  ;;  %vm1694_vm12 = vcmp.lt.s32.totalorder %v1673_v45, 3 }
 0x188   :  { %2150 = vsinq.f32 %v1542_v20  ;;  %v1623_v0 = vsub.s32 0, %v3914_v35  ;;  %v1696_v50 = vsel %vm1692_vm14, %v1676_v52, %v1679_v61  ;;  %v1698_v53 = vsel %vm1694_vm12, %v1682_v36, %v1697_v48 }
 0x189   :  { %v1700_v22 = vsel %vm1692_vm14, %v1679_v61, %v1682_v36  ;;  %v1701_v44 = vsel %vm1695_vm11, %v1688_v58, 920167782  ;;  %v1704_v9 = vsel %vm1692_vm14, %v1682_v36, %v1685_v57  ;;  %v1705_v4 = vsel %vm1695_vm11, %v1691_v19, 1326507024  ;;  %v4328_v36 = vld [vmem:[#allocation6_spill] sm:$0xff] }
 0x18a   :  { %v1452_v37 = vsel %vm1445_vm5, %v1448_v60, %v1451_v6  ;;  %v3922_v7 = vand.u32 3, %v1543_v63  ;;  %v1981_v23 = vmin.u32 %v1623_v0, %v3914_v35  ;;  %v1763_v33 = vand.u32 2147483647, %v4325_v47 }
 0x18b   :  { %v1644_v25 = vsel %vm1559_vm10, %v1643_v55, %v1619_v17  ;;  %v1702_v16 = vsel %vm1694_vm12, %v1685_v57, %v1701_v44  ;;  %v1706_v5 = vsel %vm1694_vm12, %v1688_v58, %v1705_v4  ;;  %v1767_v39 = vshrl.u32 %v1766_v29, 23 }
 0x18c   :  { %v1625_v40 = vclz %v1981_v23  ;;  %v1699_v21 = vsel %vm1693_vm15, %v1696_v50, %v1698_v53  ;;  %v1703_v52 = vsel %vm1693_vm15, %v1700_v22, %v1702_v16  ;;  %v1707_v43 = vsel %vm1693_vm15, %v1704_v9, %v1706_v5  ;;  %v4329_v23 = vld [vmem:[#allocation7_spill] sm:$0xff] }
 0x18d   :  { %v3932_v63 = vmul.u32.u64.low %v3874_v30, %v1707_v43  ;;  %v3933_v60 = vmul.u32.u64.high %v3874_v30, %v1707_v43, %v3932_v63  ;;  %v3936_v6 = vmul.u32.u64.low %v3874_v30, %v1703_v52  ;;  %v3937_v32 = vmul.u32.u64.high %v3874_v30, %v1703_v52, %v3936_v6 }
 0x18e   :  { %vm1548_vm13 = vcmp.lt.s32.totalorder %v3922_v7, 2  ;;  %v1982_v17 = vadd.s32 4294967294, %v1625_v40  ;;  %v1646_v29 = vsel %vm3907_vm9, 0, %v1644_v25  ;;  %v1988_v61 = vadd.s32 4294967169, %v1767_v39  ;;  %v4330_v39 = vld [vmem:[#allocation8_spill] sm:$0xff]  ;;  %v4331_v40 = vld [vmem:[#allocation9_spill] sm:$0xff] }
 0x18f   :  { %v3944_v57 = vmul.f32 %v4328_v36, %v2985_v2  ;;  %vm1549_vm0 = vcmp.eq.s32.totalorder %v3922_v7, 0  ;;  %vm1552_vm1 = vcmp.eq.s32.totalorder %v3922_v7, 2  ;;  %v1613_v45 = vadd.s32 %v3837_v56, %v3845_v12 }
 0x190   :  { %v1770_v26 = vand.u32 8388607, %v1763_v33  ;;  %v3954_v58 = vsel %vm1443_vm8, nan, %v1452_v37  ;;  %vm1983_vm2 = vcmp.lt.s32.totalorder %v1982_v17, 0  ;;  %v1715_v19 = vmul.u32 %v3874_v30, %v1699_v21 }
 0x191   :  { %v1773_v20 = vadd.s32 1, %v1988_v61  ;;  %v2149_v2 = vpop.eup %2148  ;;  %v1628_v48 = vsel %vm1983_vm2, 0, %v1982_v17  ;;  %v3957_v55 = vand.u32 3, %v1646_v29  ;;  %vm1717_vm3 = vc.u32 %v3933_v60, %v3936_v6  ;;  %v4332_v29 = vld [vmem:[#allocation10_spill] sm:$0xff] }
 0x192   :  { %v1718_v0 = vadd.s32 1, %v3937_v32  ;;  %v2151_v56 = vpop.eup %2150  ;;  %vm1546_vm4 = vweird.f32 %v2662_v18  ;;  %v1553_v12 = vxor.u32 2147483648, %v2149_v2  ;;  %v1629_v50 = vsub.s32 32, %v1628_v48 }
 0x193   :  { %v1630_v11 = vshll.u32 %v3914_v35, %v1628_v48  ;;  %v1633_v53 = vsub.s32 4294967266, %v1628_v48  ;;  %v1550_v22 = vxor.u32 2147483648, %v2151_v56  ;;  %v1771_v44 = vor.u32 8388608, %v1770_v26 }
 0x194   :  { %v1719_v30 = vsel %vm1717_vm3, %v1718_v0, %v3937_v32  ;;  %vm1774_vm6 = vcmp.gt.s32.totalorder %v1773_v20, 0  ;;  %v1631_v9 = vshrl.u32 %v1613_v45, %v1629_v50  ;;  %v3966_v25 = vmul.f32 %v4329_v23, %v3068_v49  ;;  %v4334_v0 = vld [vmem:[#allocation12_spill] sm:$0xff]  ;;  %v4337_v23 = vld [vmem:[#allocation15_spill] sm:$0xff] }
 0x195   :  { %v1634_v4 = vadd.s32 127, %v1633_v53  ;;  %v1720_v37 = vadd.s32 %v1719_v30, %v1715_v19  ;;  %v1554_v16 = vsel %vm1552_vm1, %v1553_v12, %v2151_v56  ;;  %v1775_v5 = vsel %vm1774_vm6, %v1773_v20, 0 }
 0x196   :  { %v3972_v35 = vmul.f32 %v4330_v39, %v3201_v13  ;;  %v3976_v21 = vmul.f32 %v4331_v40, %v3220_v62  ;;  %v1551_v52 = vsel %vm1549_vm0, %v2149_v2, %v1550_v22  ;;  %v1632_v43 = vor.u32 %v1631_v9, %v1630_v11  ;;  %v4333_v13 = vld [vmem:[#allocation11_spill] sm:$0xff]  ;;  %v4335_v9 = vld [vmem:[#allocation13_spill] sm:$0xff] }
 0x197   :  { %v1635_v63 = vshll.u32 %v1634_v4, 23  ;;  %v1721_v32 = vadd.s32 536870912, %v1720_v37  ;;  %v1777_v49 = vand.u32 31, %v1775_v5  ;;  %v3980_v17 = vshll.u32 %v1771_v44, 8  ;;  %v4336_v4 = vld [vmem:[#allocation14_spill] sm:$0xff] }
 0x198   :  { %v3984_v61 = vmul.f32 %v4332_v29, %v3435_v42  ;;  %v3988_v36 = vmul.f32 %v4333_v13, %v3439_v51  ;;  %v1639_v62 = vcvt.s32.f32 %v1632_v43  ;;  %v3991_v26 = vadd.s32 %v3936_v6, %v3933_v60 }
 0x199   :  { %v1636_v45 = vor.u32 4788187, %v1635_v63  ;;  %v3993_v19 = vshrl.u32 %v1721_v32, 30  ;;  %v1555_v20 = vsel %vm1548_vm13, %v1551_v52, %v1554_v16  ;;  %v1776_v2 = vshrl.u32 %v1775_v5, 5 }
 0x19a   :  { %v1778_v48 = vsub.s32 32, %v1777_v49  ;;  %v3999_v42 = vmul.f32 %v4334_v0, %v3567_v1  ;;  %v1780_v12 = vshll.u32 %v4256_v14, %v1777_v49  ;;  %v1783_v50 = vshll.u32 %v4261_v38, %v1777_v49 }
 0x19b   :  { %v1637_v56 = vand.u32 2147483647, %v1636_v45  ;;  %v1723_v51 = vshll.u32 %v3993_v19, 30  ;;  %v1786_v7 = vshll.u32 %v4263_v41, %v1777_v49  ;;  %v1789_v11 = vshll.u32 %v4265_v3, %v1777_v49 }
 0x19c   :  { %v1781_v60 = vshrl.u32 %v4261_v38, %v1778_v48  ;;  %v1784_v6 = vshrl.u32 %v4263_v41, %v1778_v48  ;;  %v1787_v1 = vshrl.u32 %v4265_v3, %v1778_v48  ;;  %v1790_v30 = vshrl.u32 %v4275_v54, %v1778_v48 }
 0x19d   :  { %v1640_v53 = vmul.f32 %v1639_v62, %v1637_v56  ;;  %v4008_v22 = vsub.s32 %v1720_v37, %v1723_v51  ;;  %v4014_v44 = vsel %vm1546_vm4, nan, %v1555_v20  ;;  %v4018_v38 = vmul.f32 %v4335_v9, %v3571_v28  ;;  %v4338_v56 = vld [vmem:[#allocation16_spill] sm:$0xff] }
 0x19e   :  { %v4022_v41 = vmul.f32 %v4336_v4, %v3655_v59  ;;  %v4026_v37 = vmul.f32 %v4337_v23, %v3852_v31  ;;  %v1779_v5 = vshrl.u32 %v4256_v14, %v1778_v48  ;;  %v1782_v18 = vor.u32 %v1781_v60, %v1780_v12  ;;  %v4340_v4 = vld [vmem:[#allocation5_spill] sm:$0xff] }
 0x19f   :  { %v1641_v16 = vxor.u32 2147483648, %v1640_v53  ;;  %v1726_v3 = vsub.s32 0, %v4008_v22  ;;  %v1785_v39 = vor.u32 %v1784_v6, %v1783_v50  ;;  %v1791_v40 = vor.u32 %v1790_v30, %v1789_v11 }
 0x1a0   :  { %v1792_v52 = vshll.u32 %v4275_v54, %v1777_v49  ;;  %v1793_v28 = vshrl.u32 %v4276_v24, %v1778_v48  ;;  %v1788_v63 = vor.u32 %v1787_v1, %v1786_v7  ;;  %vm1795_vm7 = vcmp.lt.s32.totalorder %v1776_v2, 1 }
 0x1a1   :  { %v1642_v59 = vsel %vm1559_vm10, %v1641_v16, %v1640_v53  ;;  %v1985_v43 = vmin.u32 %v1726_v3, %v4008_v22  ;;  %vm1796_vm5 = vcmp.lt.s32.totalorder %v1776_v2, 2  ;;  %vm1797_vm8 = vcmp.lt.s32.totalorder %v1776_v2, 3  ;;  %v4339_v53 = vld [vmem:[#allocation17_spill] sm:$0xff] }
 0x1a2   :  { %v1645_v31 = vsel %vm3907_vm9, %v2733_v8, %v1642_v59  ;;  %v1794_v32 = vor.u32 %v1793_v28, %v1792_v52  ;;  %vm1798_vm11 = vcmp.lt.s32.totalorder %v1776_v2, 4  ;;  %v1799_v54 = vsel %vm1795_vm7, %v1779_v5, %v1782_v18 }
 0x1a3   :  { %2152 = vcosq.f32 %v1645_v31  ;;  %v1728_v14 = vclz %v1985_v43  ;;  %v1800_v24 = vsel %vm1798_vm11, %v1788_v63, 2102212464  ;;  %v1803_v49 = vsel %vm1795_vm7, %v1782_v18, %v1785_v39 }
 0x1a4   :  { %2154 = vsinq.f32 %v1645_v31  ;;  %v1804_v29 = vsel %vm1798_vm11, %v1791_v40, 920167782  ;;  %vm1655_vm10 = vcmp.eq.s32.totalorder %v3957_v55, 2  ;;  %v1801_v45 = vsel %vm1797_vm8, %v1785_v39, %v1800_v24 }
 0x1a5   :  { %v1986_v13 = vadd.s32 4294967294, %v1728_v14  ;;  %v1805_v34 = vsel %vm1797_vm8, %v1788_v63, %v1804_v29  ;;  %v1807_v62 = vsel %vm1795_vm7, %v1785_v39, %v1788_v63  ;;  %vm1652_vm9 = vcmp.eq.s32.totalorder %v3957_v55, 0 }
 0x1a6   :  { %v1802_v20 = vsel %vm1796_vm5, %v1799_v54, %v1801_v45  ;;  %v1806_v48 = vsel %vm1796_vm5, %v1803_v49, %v1805_v34  ;;  %v1808_v0 = vsel %vm1798_vm11, %v1794_v32, 1326507024  ;;  %v1876_v51 = vmul.f32 %v4338_v56, %v3858_v10 }
 0x1a7   :  { %vm1651_vm14 = vcmp.lt.s32.totalorder %v3957_v55, 2  ;;  %vm1987_vm15 = vcmp.lt.s32.totalorder %v1986_v13, 0  ;;  %v1809_v12 = vsel %vm1797_vm8, %v1791_v40, %v1808_v0  ;;  %vm1649_vm12 = vweird.f32 %v2733_v8  ;;  %v2168_v8 = vld [vmem:[%s4220_s1 + $0x78] sm:$0xff] }
 0x1a8   :  { %v4052_v50 = vmul.u32.u64.low %v3980_v17, %v1806_v48  ;;  %v4053_v60 = vmul.u32.u64.high %v3980_v17, %v1806_v48, %v4052_v50  ;;  %v1731_v6 = vsel %vm1987_vm15, 0, %v1986_v13  ;;  %v1810_v7 = vsel %vm1796_vm5, %v1807_v62, %v1809_v12 }
 0x1a9   :  { %v1818_v11 = vmul.u32 %v3980_v17, %v1802_v20  ;;  %v1877_v10 = vmul.f32 %v4339_v53, %v3878_v46  ;;  %v1732_v1 = vsub.s32 32, %v1731_v6  ;;  %v1733_v30 = vshll.u32 %v4008_v22, %v1731_v6  ;;  %v4342_v20 = vld [vmem:[#allocation19_spill] sm:$0xff] }
 0x1aa   :  { %v1736_v9 = vsub.s32 4294967266, %v1731_v6  ;;  %v1878_v23 = vmul.f32 %v4340_v4, %v3954_v58  ;;  %v4065_v16 = vmul.u32.u64.low %v3980_v17, %v1810_v7  ;;  %v4066_v3 = vmul.u32.u64.high %v3980_v17, %v1810_v7, %v4065_v16 }
 0x1ab   :  { %v4071_v2 = vstv %s4221_s0  ;;  %vm1901_vm13 = vcmask 7168   ;;  %v1734_v5 = vshrl.u32 %v3991_v26, %v1732_v1  ;;  %v1821_v18 = vadd.s32 1, %v4053_v60 }
 0x1ac   :  { %v1737_v46 = vadd.s32 127, %v1736_v9  ;;  %v1884_v22 = vmul.f32 %v4071_v2, %v3944_v57  ;;  %v1885_v58 = vmul.f32 %v4071_v2, %v3966_v25  ;;  %v1886_v17 = vmul.f32 %v4071_v2, %v3972_v35 }
 0x1ad   :  { %v1887_v39 = vmul.f32 %v4071_v2, %v3976_v21  ;;  %v1888_v40 = vmul.f32 %v4071_v2, %v3984_v61  ;;  %v2153_v52 = vpop.eup %2152  ;;  %v1735_v26 = vor.u32 %v1734_v5, %v1733_v30  ;;  %v1889_v59 = vmul.f32 %v4071_v2, %v3988_v36  ;;  %v4341_v21 = vld [vmem:[#allocation18_spill] sm:$0xff] }
 0x1ae   :  { %v1738_v28 = vshll.u32 %v1737_v46, 23  ;;  %v1890_v57 = vmul.f32 %v4071_v2, %v3999_v42  ;;  %1902 = vst.msk [vmem:[%s4222_s2] sm:$0xff] %vm1901_vm13, %v1884_v22  ;;  %v2155_v25 = vpop.eup %2154  ;;  %v1656_v35 = vxor.u32 2147483648, %v2153_v52  ;;  %vm1820_vm0 = vc.u32 %v4066_v3, %v4052_v50  ;;  %1903 = vst.msk [vmem:[%s4222_s2 + $0x8] sm:$0xff] %vm1901_vm13, %v1885_v58 }
 0x1af   :  { %v1879_v61 = vmul.f32 %v4341_v21, %v4014_v44  ;;  %v1891_v43 = vmul.f32 %v4071_v2, %v4018_v38  ;;  %1904 = vst.msk [vmem:[%s4222_s2 + $0x10] sm:$0xff] %vm1901_vm13, %v1886_v17  ;;  %1905 = vst.msk [vmem:[%s4222_s2 + $0x18] sm:$0xff] %vm1901_vm13, %v1887_v39  ;;  %v1653_v36 = vxor.u32 2147483648, %v2155_v25  ;;  %v1742_v44 = vcvt.s32.f32 %v1735_v26 }
 0x1b0   :  { %1906 = vst.msk [vmem:[%s4222_s2 + $0x20] sm:$0xff] %vm1901_vm13, %v1888_v40  ;;  %v1739_v42 = vor.u32 4788187, %v1738_v28  ;;  %v1822_v38 = vsel %vm1820_vm0, %v1821_v18, %v4053_v60  ;;  %1907 = vst.msk [vmem:[%s4222_s2 + $0x28] sm:$0xff] %vm1901_vm13, %v1889_v59  ;;  %v1657_v63 = vsel %vm1655_vm10, %v1656_v35, %v2155_v25  ;;  %v1892_v32 = vmul.f32 %v4071_v2, %v4022_v41 }
 0x1b1   :  { %1908 = vst.msk [vmem:[%s4222_s2 + $0x30] sm:$0xff] %vm1901_vm13, %v1890_v57  ;;  %v1823_v31 = vadd.s32 %v1822_v38, %v1818_v11  ;;  %v1893_v14 = vmul.f32 %v4071_v2, %v4026_v37  ;;  %1909 = vst.msk [vmem:[%s4222_s2 + $0x38] sm:$0xff] %vm1901_vm13, %v1891_v43  ;;  %v1654_v54 = vsel %vm1652_vm9, %v2153_v52, %v1653_v36  ;;  %vm1662_vm1 = vcmp.lt.s32.totalorder %v4322_v27, 0 }
 0x1b2   :  { %v1740_v24 = vand.u32 2147483647, %v1739_v42  ;;  %v1894_v49 = vmul.f32 %v4071_v2, %v1876_v51  ;;  %v1895_v29 = vmul.f32 %v4071_v2, %v1877_v10  ;;  %v1658_v13 = vsel %vm1651_vm14, %v1654_v54, %v1657_v63  ;;  %1910 = vst.msk [vmem:[%s4222_s2 + $0x40] sm:$0xff] %vm1901_vm13, %v1892_v32 }
 0x1b3   :  { %v1824_v41 = vadd.s32 536870912, %v1823_v31  ;;  %v1896_v45 = vmul.f32 %v4071_v2, %v1878_v23  ;;  %v1897_v37 = vmul.f32 %v4071_v2, %v1879_v61  ;;  %1911 = vst.msk [vmem:[%s4222_s2 + $0x48] sm:$0xff] %vm1901_vm13, %v1893_v14  ;;  %v1659_v34 = vsel %vm1649_vm12, nan, %v1658_v13 }
 0x1b4   :  { %v1743_v55 = vmul.f32 %v1742_v44, %v1740_v24  ;;  %1912 = vst.msk [vmem:[%s4222_s2 + $0x50] sm:$0xff] %vm1901_vm13, %v1894_v49  ;;  %1913 = vst.msk [vmem:[%s4222_s2 + $0x58] sm:$0xff] %vm1901_vm13, %v1895_v29  ;;  %v1880_v48 = vmul.f32 %v4342_v20, %v1659_v34  ;;  %v45_v0 = vmul.f32 -0.33333334, %v2168_v8  ;;  %vm4177_vm2 = vcmp.le.f32.partialorder %v1660_v15, 0.7853982 }
 0x1b5   :  { %v4161_v62 = vshrl.u32 %v1824_v41, 30  ;;  %1914 = vst.msk [vmem:[%s4222_s2 + $0x60] sm:$0xff] %vm1901_vm13, %v1896_v45  ;;  %1915 = vst.msk [vmem:[%s4222_s2 + $0x68] sm:$0xff] %vm1901_vm13, %v1897_v37  ;;  %v1746_v12 = vsub.s32 4, %v3993_v19  ;;  %v1819_v5 = vadd.s32 %v4052_v50, %v4066_v3  ;;  %vm1752_vm5 = vweird.f32 %v4322_v27 }
 0x1b6   :  { %v1744_v51 = vxor.u32 2147483648, %v1743_v55  ;;  %v1898_v6 = vmul.f32 %v4071_v2, %v1880_v48  ;;  %v77_v15 = vmul.f32 1.442695, %v45_v0  ;;  %vm1765_vm8 = vcmp.lt.s32.totalorder %v4325_v47, 0 }
 0x1b7   :  { %v1826_v60 = vshll.u32 %v4161_v62, 30  ;;  %v1747_v10 = vsel %vm1662_vm1, %v1746_v12, %v3993_v19  ;;  %vm1764_vm11 = vcmp.le.f32.partialorder %v1763_v33, 0.7853982  ;;  %vm1855_vm15 = vweird.f32 %v4325_v47 }
 0x1b8   :  { %v1745_v7 = vsel %vm1662_vm1, %v1744_v51, %v1743_v55  ;;  %1916 = vst.msk [vmem:[%s4222_s2 + $0x70] sm:$0xff] %vm1901_vm13, %v1898_v6  ;;  %v1749_v30 = vsel %vm4177_vm2, 0, %v1747_v10  ;;  %vm1918_vm12 = vcmask 1024  }
 0x1b9   :  { %v1748_v11 = vsel %vm4177_vm2, %v4322_v27, %v1745_v7  ;;  %v1827_v53 = vsub.s32 %v1823_v31, %v1826_v60  ;;  %v1753_v23 = vand.u32 3, %v1749_v30  ;;  %v2169_v27 = vld [vmem:[%s4220_s1 + $0x80] sm:$0x3]  ;;  %v1849_v31 = vsub.s32 4, %v4161_v62 }
 0x1ba   :  { %2156 = vcosq.f32 %v1748_v11  ;;  %v46_v38 = vmul.f32 -0.33333334, %v2169_v27 }
 0x1bb   :  { %2158 = vsinq.f32 %v1748_v11  ;;  %v1829_v1 = vsub.s32 0, %v1827_v53  ;;  %vm1755_vm4 = vcmp.eq.s32.totalorder %v1753_v23, 0  ;;  %vm1758_vm6 = vcmp.eq.s32.totalorder %v1753_v23, 2 }
 0x1bc   :  { %2160 = vpow2.f32 %v77_v15  ;;  %vm1754_vm7 = vcmp.lt.s32.totalorder %v1753_v23, 2  ;;  %v79_v54 = vmul.f32 1.442695, %v46_v38  ;;  %v1850_v24 = vsel %vm1765_vm8, %v1849_v31, %v4161_v62 }
 0x1bd   :  { %v1989_v9 = vmin.u32 %v1829_v1, %v1827_v53  ;;  %v1852_v49 = vsel %vm1764_vm11, 0, %v1850_v24 }
 0x1be   :  { %v1856_v29 = vand.u32 3, %v1852_v49 }
 0x1bf   :  { %v1831_v4 = vclz %v1989_v9 }
 0x1c0   :  { %vm1861_vm10 = vcmp.eq.s32.totalorder %v1856_v29, 2  ;;  %vm1858_vm9 = vcmp.eq.s32.totalorder %v1856_v29, 0  ;;  %vm1857_vm14 = vcmp.lt.s32.totalorder %v1856_v29, 2 }
 0x1c1   :  { %v1990_v16 = vadd.s32 4294967294, %v1831_v4 }
 0x1c3   :  { %vm1991_vm3 = vcmp.lt.s32.totalorder %v1990_v16, 0 }
 0x1c4   :  { %v2157_v46 = vpop.eup %2156  ;;  %v1834_v18 = vsel %vm1991_vm3, 0, %v1990_v16 }
 0x1c5   :  { %v2159_v19 = vpop.eup %2158  ;;  %v1759_v22 = vxor.u32 2147483648, %v2157_v46  ;;  %v1835_v58 = vsub.s32 32, %v1834_v18  ;;  %v1836_v17 = vshll.u32 %v1827_v53, %v1834_v18  ;;  %v1839_v39 = vsub.s32 4294967266, %v1834_v18 }
 0x1c6   :  { %v1756_v40 = vxor.u32 2147483648, %v2159_v19  ;;  %v2161_v59 = vpop.eup %2160 }
 0x1c7   :  { %v1760_v52 = vsel %vm1758_vm6, %v1759_v22, %v2159_v19  ;;  %v1837_v26 = vshrl.u32 %v1819_v5, %v1835_v58  ;;  %v1840_v28 = vadd.s32 127, %v1839_v39 }
 0x1c8   :  { %v1757_v57 = vsel %vm1755_vm4, %v2157_v46, %v1756_v40 }
 0x1c9   :  { %v1761_v50 = vsel %vm1754_vm7, %v1757_v57, %v1760_v52  ;;  %v1838_v3 = vor.u32 %v1837_v26, %v1836_v17  ;;  %v1841_v25 = vshll.u32 %v1840_v28, 23 }
 0x1ca   :  { %v1762_v35 = vsel %vm1752_vm5, nan, %v1761_v50 }
 0x1cb   :  { %v1842_v21 = vor.u32 4788187, %v1841_v25  ;;  %v1845_v61 = vcvt.s32.f32 %v1838_v3  ;;  %v1881_v43 = vmul.f32 %v2161_v59, %v1762_v35 }
 0x1cd   :  { %v1843_v36 = vand.u32 2147483647, %v1842_v21  ;;  %v1899_v42 = vmul.f32 %v4071_v2, %v1881_v43 }
 0x1cf   :  { %v1846_v44 = vmul.f32 %v1845_v61, %v1843_v36  ;;  %1917 = vst.msk [vmem:[%s4222_s2 + $0x78] sm:$0xff] %vm1901_vm13, %v1899_v42 }
 0x1d1   :  { %v1847_v63 = vxor.u32 2147483648, %v1846_v44 }
 0x1d3   :  { %v1848_v32 = vsel %vm1765_vm8, %v1847_v63, %v1846_v44 }
 0x1d4   :  { %v1851_v14 = vsel %vm1764_vm11, %v4325_v47, %v1848_v32 }
 0x1d5   :  { %2162 = vcosq.f32 %v1851_v14 }
 0x1d6   :  { %2164 = vsinq.f32 %v1851_v14 }
 0x1d7   :  { %2166 = vpow2.f32 %v79_v54 }
 0x1df   :  { %v2163_v13 = vpop.eup %2162 }
 0x1e0   :  { %v2165_v41 = vpop.eup %2164  ;;  %v1862_v45 = vxor.u32 2147483648, %v2163_v13 }
 0x1e1   :  { %v1859_v33 = vxor.u32 2147483648, %v2165_v41  ;;  %v2167_v34 = vpop.eup %2166 }
 0x1e2   :  { %v1863_v37 = vsel %vm1861_vm10, %v1862_v45, %v2165_v41 }
 0x1e3   :  { %v1860_v55 = vsel %vm1858_vm9, %v2163_v13, %v1859_v33 }
 0x1e4   :  { %v1864_v20 = vsel %vm1857_vm14, %v1860_v55, %v1863_v37 }
 0x1e5   :  { %v1865_v48 = vsel %vm1855_vm15, nan, %v1864_v20 }
 0x1e6   :  { %v1882_v62 = vmul.f32 %v2167_v34, %v1865_v48 }
 0x1e8   :  { %v1900_v8 = vmul.f32 %v4071_v2, %v1882_v62 }
 0x1ea   :  { %1919 = vst.msk [vmem:[%s4222_s2 + $0x80] sm:$0x3] %vm1918_vm12, %v1900_v8 }

</bundles_post_ra>
